<compile_context>
chip_gen: v7x
topology: tpu7x:2x2x1
jax: 0.10.0
libtpu: 0.0.40
codegen_flags: <defaults>
</compile_context>

<pallas_src>
import functools

import jax
import jax.numpy as jnp
from jax.experimental import pallas as pl
from jax.experimental.pallas import tpu as pltpu


def graph_block_kernel(x_ref, gg_bd_ref, tg_ref,
                       w_proj_ref, b_proj_ref,
                       wz_g_ref, wz_t_ref, b_fc_ref,
                       out_ref):
    """One batch block of Kb (b,t) slices, processed with large matmuls.

    x_ref     : (Kb*N, in_dim)   rows of all Kb slices stacked
    gg_bd_ref : (Kb*N, Kb*N)     I_Kb (x) gg   (shared global graph, block-diag)
    tg_ref    : (Kb, N, N)       per-slice temporal graphs
    out_ref   : (Kb, N, out_dim) f32
    """
    f32 = jnp.float32
    kb, n, _ = tg_ref.shape
    out_dim = out_ref.shape[-1]

    # All math in f32; bf16 (if any) is HBM/DMA-side only (cheaper on v5e's
    # non-bf16 VPU and avoids double rounding between matmuls).
    x = x_ref[...].astype(f32)

    # 1) Fused twin GCN projection for the whole block: ONE MXU matmul.
    #    h = relu(x @ [Wg | Wt] + [bg | bt])                 (Kb*N, 2*out)
    h = jnp.dot(x, w_proj_ref[...], preferred_element_type=f32) + b_proj_ref[...]
    h = jnp.maximum(h, 0.0)

    # 2) Reassociated fc halves (wz_* are zero-padded -> no lane slicing of h).
    z_g = jnp.dot(h, wz_g_ref[...], preferred_element_type=f32)   # (Kb*N, out)
    z_t = jnp.dot(h, wz_t_ref[...], preferred_element_type=f32)   # (Kb*N, out)

    # 3) Global branch: gg is shared by every (b,t) slice -> ONE matmul against
    #    the block-diagonal I_Kb (x) gg.  K = Kb*N fills the MXU contraction dim
    #    and no in-kernel transpose/relayout of z_g is needed.
    g_x = jnp.dot(gg_bd_ref[...].astype(f32), z_g,
                  preferred_element_type=f32)                     # (Kb*N, out)

    # 4) Temporal branch: graphs differ per slice -> batched matmul.
    t_x = jnp.einsum('knm,kmo->kno',
                     tg_ref[...].astype(f32),
                     z_t.reshape(kb, n, out_dim),
                     preferred_element_type=f32)                  # (Kb, N, out)

    # 5) Fuse both branches + fc bias + relu; single store of the whole block.
    acc = g_x.reshape(kb, n, out_dim) + t_x + b_fc_ref[...]
    out_ref[...] = jnp.maximum(acc, 0.0).astype(out_ref.dtype)


def prepare_params(params):
    """One-time parameter prep (transposes / splits / bias merge), not per call.

    Weights and biases stay f32 (they are tiny); only the big per-call streams
    (x, temporal graph, block-diag global graph) are optionally stored bf16.
    """
    f32 = jnp.float32
    out_dim = params["wg"].shape[1]
    w_proj = jnp.concatenate([params["wg"], params["wt"]], axis=1)          # (in, 2*out)
    b_proj = jnp.concatenate([params["bg"], params["bt"]]).reshape(1, -1)   # (1, 2*out)
    wfc_t = params["wfc"].T                                                 # (2*out, out)
    zeros = jnp.zeros((out_dim, out_dim), wfc_t.dtype)
    wz_g = jnp.concatenate([wfc_t[:out_dim, :], zeros], axis=0)             # [Wfc_g ; 0]
    wz_t = jnp.concatenate([zeros, wfc_t[out_dim:, :]], axis=0)             # [0 ; Wfc_t]
    b_fc = params["bfc"].reshape(1, -1)                                     # (1, out)
    return {"w_proj": w_proj.astype(f32), "b_proj": b_proj.astype(f32),
            "wz_g": wz_g.astype(f32), "wz_t": wz_t.astype(f32),
            "b_fc": b_fc.astype(f32)}


@functools.partial(jax.jit, static_argnames=("block_bt", "storage_dtype"))
def graph_block(x, global_graph, temporal_graph, prep, *,
                block_bt=None, storage_dtype=jnp.bfloat16):
    """x: (B, T, N, in_dim); global_graph: (N, N); temporal_graph: (B, T, N, N).

    Returns f32 (B, T, N, out_dim).  `storage_dtype` only affects HBM-side
    streams (x / temporal graph / block-diag global graph); in-kernel math and
    the output are f32.
    """
    B, T, N, in_dim = x.shape
    out_dim = prep["b_fc"].shape[-1]
    BT = B * T
    kb = BT if block_bt is None else block_bt
    assert BT % kb == 0, "block_bt must divide B*T"
    num_blocks = BT // kb
    sd = storage_dtype

    # Layout plumbing in the wrapper (free): flatten batch*time, stack node rows.
    x2 = x.reshape(BT * N, in_dim).astype(sd)                       # (BT*N, in)
    tg2 = temporal_graph.reshape(BT, N, N).astype(sd)               # (BT, N, N)
    # Shared global graph embedded block-diagonally: I_kb (x) gg.  Built once
    # per call; replicated (not re-fetched per block) by its BlockSpec.
    gg_bd = jnp.kron(jnp.eye(kb, dtype=jnp.float32),
                     global_graph.astype(jnp.float32)).astype(sd)   # (kb*N, kb*N)

    def rep(shape):  # replicated operand: same block for every grid step
        return pl.BlockSpec(shape, lambda i: (0,) * len(shape))

    flops = (2 * BT * N * in_dim * 2 * out_dim              # fused projection
             + 2 * 2 * BT * N * 2 * out_dim * out_dim       # two fc-half matmuls
             + 2 * num_blocks * (kb * N) ** 2 * out_dim     # global (block-diag)
             + 2 * BT * N * N * out_dim)                    # temporal (batched)
    isz = jnp.dtype(sd).itemsize
    bytes_accessed = ((BT * N * in_dim + BT * N * N + (kb * N) ** 2) * isz
                      + BT * N * out_dim * 4
                      + 4 * (in_dim * 2 * out_dim + 2 * out_dim
                             + 2 * 2 * out_dim * out_dim + out_dim))

    out3 = pl.pallas_call(
        graph_block_kernel,
        out_shape=jax.ShapeDtypeStruct((BT, N, out_dim), jnp.float32),
        grid=(num_blocks,),
        in_specs=[
            pl.BlockSpec((kb * N, in_dim), lambda i: (i, 0)),   # x rows of block i
            rep((kb * N, kb * N)),                              # I_kb (x) gg (shared)
            pl.BlockSpec((kb, N, N), lambda i: (i, 0, 0)),      # temporal graphs
            rep((in_dim, 2 * out_dim)),                         # [Wg | Wt]
            rep((1, 2 * out_dim)),                              # [bg | bt]
            rep((2 * out_dim, out_dim)),                        # [Wfc_g ; 0]
            rep((2 * out_dim, out_dim)),                        # [0 ; Wfc_t]
            rep((1, out_dim)),                                  # bfc
        ],
        out_specs=pl.BlockSpec((kb, N, out_dim), lambda i: (i, 0, 0)),
        compiler_params=pltpu.CompilerParams(
            dimension_semantics=("parallel",),
            vmem_limit_bytes=32 * 1024 * 1024),
        cost_estimate=pl.CostEstimate(flops=flops, transcendentals=0,
                                      bytes_accessed=bytes_accessed),
    )(x2, gg_bd, tg2, prep["w_proj"], prep["b_proj"],
      prep["wz_g"], prep["wz_t"], prep["b_fc"])

    # TODO(synk): large-N path: tile gg/tg as (tm, tk) blocks with a reduction
    #   grid axis ("arbitrary") + f32 accumulator scratch; on v7x use ~half the
    #   v6e/v5e tile footprint (64 MiB physical VMEM) and single-buffer the
    #   replicated gg/weight specs (pipeline_mode=pl.Buffered(1)).  Padding
    #   out_dim (32) to 128 for unmasked stores was evaluated but not applied:
    #   at N*out_dim = 512 the masked-store cost is below the extra HBM traffic.
    return out3.reshape(B, T, N, out_dim)


def graph_block_ref(x, gg, tg, params):
    """Pure-JAX reference mirroring GraphBlock.forward (norm=None, use_g=use_t=True)."""
    h_g = jax.nn.relu(params["bg"] + x @ params["wg"])
    g_x = jnp.matmul(gg, h_g)                       # (N,N) broadcast over (B,T)
    h_t = jax.nn.relu(params["bt"] + x @ params["wt"])
    t_x = jnp.matmul(tg, h_t)                       # per-(b,t) temporal graph
    cat = jnp.concatenate([g_x, t_x], axis=-1)
    return jax.nn.relu(cat @ params["wfc"].T + params["bfc"])


if __name__ == "__main__":
    B, T, N = 2, 8, 16          # batch, time (in_len), num_nodes
    in_dim, out_dim = 4, 32
    embed = 6

    key = jax.random.PRNGKey(0)
    ks = jax.random.split(key, 8)

    x = jax.random.normal(ks[0], (B, T, N, in_dim), dtype=jnp.float32)

    # Graphs shaped as the surrounding Model produces them:
    #   global_graph   = sigmoid(E @ E.T)              (N, N), shared
    #   temporal_graph = sigmoid(f @ f.T) per (b, t)   (B, T, N, N)
    emb = jax.random.normal(ks[1], (N, embed), dtype=jnp.float32)
    global_graph = jax.nn.sigmoid(emb @ emb.T)
    tfeat = jax.random.normal(ks[2], (B, T, N, embed), dtype=jnp.float32)
    temporal_graph = jax.nn.sigmoid(jnp.einsum("btnd,btmd->btnm", tfeat, tfeat))

    params = {
        # GCN params: w ~ randn, b = zeros (matches nn.Parameter init in module)
        "wg": jax.random.normal(ks[3], (in_dim, out_dim), dtype=jnp.float32),
        "bg": jnp.zeros((out_dim,), dtype=jnp.float32),
        "wt": jax.random.normal(ks[4], (in_dim, out_dim), dtype=jnp.float32),
        "bt": jnp.zeros((out_dim,), dtype=jnp.float32),
        # fc = nn.Linear(2*out_dim, out_dim): weight (out_dim, 2*out_dim), bias (out_dim,)
        "wfc": 0.1 * jax.random.normal(ks[5], (out_dim, 2 * out_dim), dtype=jnp.float32),
        "bfc": jnp.zeros((out_dim,), dtype=jnp.float32),
    }
    # TODO(synk): norm=LayerNorm branch of GraphBlock not exercised (module default norm=None).

    ref = graph_block_ref(x, global_graph, temporal_graph, params)
    prep = prepare_params(params)

    # --- f32 HBM streams, whole batch in ONE grid step ---
    out_f32 = jax.block_until_ready(
        graph_block(x, global_graph, temporal_graph, prep, storage_dtype=jnp.float32))
    assert out_f32.shape == (B, T, N, out_dim)
    assert out_f32.dtype == jnp.float32
    assert jnp.allclose(out_f32, ref, atol=1e-3, rtol=1e-3)

    # --- bf16 HBM streams (halves DMA bytes on the dominant tg stream), f32 compute ---
    out_bf16 = jax.block_until_ready(
        graph_block(x, global_graph, temporal_graph, prep, storage_dtype=jnp.bfloat16))
    assert out_bf16.dtype == jnp.float32
    assert jnp.allclose(out_bf16, ref, atol=1.0, rtol=1e-1)

    # --- multi-step grid path (2 batch blocks of 8 slices), f32 ---
    out_blk = jax.block_until_ready(
        graph_block(x, global_graph, temporal_graph, prep,
                    block_bt=8, storage_dtype=jnp.float32))
    assert jnp.allclose(out_blk, ref, atol=1e-3, rtol=1e-3)

    print("KERNEL_OK")
</pallas_src>

<mosaic_0001>
module attributes {stable_mosaic.version = 11 : i64} {
  func.func @graph_block_kernel(%arg0: i32, %arg1: memref<256x4xf32, #tpu.memory_space<vmem>>, %arg2: memref<256x256xf32, #tpu.memory_space<vmem>>, %arg3: memref<16x16x16xf32, #tpu.memory_space<vmem>>, %arg4: memref<4x64xf32, #tpu.memory_space<vmem>>, %arg5: memref<1x64xf32, #tpu.memory_space<vmem>>, %arg6: memref<64x32xf32, #tpu.memory_space<vmem>>, %arg7: memref<64x32xf32, #tpu.memory_space<vmem>>, %arg8: memref<1x32xf32, #tpu.memory_space<vmem>>, %arg9: memref<16x16x32xf32, #tpu.memory_space<vmem>>) attributes {dimension_semantics = [#tpu.dimension_semantics<parallel>], iteration_bounds = array<i64: 1>, scalar_prefetch = 0 : i64, scratch_operands = 0 : i64, tpu.core_type = #tpu.core_type<tc>, window_params = [{transform_indices = @transform_0, window_bounds = array<i64: 256, 4>}, {pipeline_mode = #tpu.pipeline_mode<synchronous>, transform_indices = @transform_1, window_bounds = array<i64: 256, 256>}, {transform_indices = @transform_2, window_bounds = array<i64: 16, 16, 16>}, {pipeline_mode = #tpu.pipeline_mode<synchronous>, transform_indices = @transform_3, window_bounds = array<i64: 4, 64>}, {pipeline_mode = #tpu.pipeline_mode<synchronous>, transform_indices = @transform_4, window_bounds = array<i64: 1, 64>}, {pipeline_mode = #tpu.pipeline_mode<synchronous>, transform_indices = @transform_5, window_bounds = array<i64: 64, 32>}, {pipeline_mode = #tpu.pipeline_mode<synchronous>, transform_indices = @transform_6, window_bounds = array<i64: 64, 32>}, {pipeline_mode = #tpu.pipeline_mode<synchronous>, transform_indices = @transform_7, window_bounds = array<i64: 1, 32>}, {transform_indices = @transform_8, window_bounds = array<i64: 16, 16, 32>}]} {
    %c0 = arith.constant 0 : index
    %c0_0 = arith.constant 0 : index
    %0 = vector.load %arg1[%c0, %c0_0] : memref<256x4xf32, #tpu.memory_space<vmem>>, vector<256x4xf32>
    %c0_1 = arith.constant 0 : index
    %c0_2 = arith.constant 0 : index
    %1 = vector.load %arg4[%c0_1, %c0_2] : memref<4x64xf32, #tpu.memory_space<vmem>>, vector<4x64xf32>
    %cst = arith.constant dense<0.000000e+00> : vector<256x64xf32>
    %2 = tpu.matmul %0, %1, %cst {dimension_numbers = #tpu.dot_dimension_numbers<[1], [0], [0], [1], [0, 0, 1, 1], [], []>} : vector<256x4xf32>, vector<4x64xf32>, vector<256x64xf32> -> vector<256x64xf32>
    %c0_3 = arith.constant 0 : index
    %c0_4 = arith.constant 0 : index
    %3 = vector.load %arg5[%c0_3, %c0_4] : memref<1x64xf32, #tpu.memory_space<vmem>>, vector<1x64xf32>
    %4 = vector.broadcast %3 : vector<1x64xf32> to vector<256x64xf32>
    %5 = arith.addf %2, %4 : vector<256x64xf32>
    %cst_5 = arith.constant 0.000000e+00 : f32
    %6 = vector.broadcast %cst_5 : f32 to vector<256x64xf32>
    %7 = arith.maximumf %5, %6 : vector<256x64xf32>
    %c0_6 = arith.constant 0 : index
    %c0_7 = arith.constant 0 : index
    %8 = vector.load %arg6[%c0_6, %c0_7] : memref<64x32xf32, #tpu.memory_space<vmem>>, vector<64x32xf32>
    %cst_8 = arith.constant dense<0.000000e+00> : vector<256x32xf32>
    %9 = tpu.matmul %7, %8, %cst_8 {dimension_numbers = #tpu.dot_dimension_numbers<[1], [0], [0], [1], [0, 0, 1, 1], [], []>} : vector<256x64xf32>, vector<64x32xf32>, vector<256x32xf32> -> vector<256x32xf32>
    %c0_9 = arith.constant 0 : index
    %c0_10 = arith.constant 0 : index
    %10 = vector.load %arg7[%c0_9, %c0_10] : memref<64x32xf32, #tpu.memory_space<vmem>>, vector<64x32xf32>
    %cst_11 = arith.constant dense<0.000000e+00> : vector<256x32xf32>
    %11 = tpu.matmul %7, %10, %cst_11 {dimension_numbers = #tpu.dot_dimension_numbers<[1], [0], [0], [1], [0, 0, 1, 1], [], []>} : vector<256x64xf32>, vector<64x32xf32>, vector<256x32xf32> -> vector<256x32xf32>
    %c0_12 = arith.constant 0 : index
    %c0_13 = arith.constant 0 : index
    %12 = vector.load %arg2[%c0_12, %c0_13] : memref<256x256xf32, #tpu.memory_space<vmem>>, vector<256x256xf32>
    %cst_14 = arith.constant dense<0.000000e+00> : vector<256x32xf32>
    %13 = tpu.matmul %12, %9, %cst_14 {dimension_numbers = #tpu.dot_dimension_numbers<[1], [0], [0], [1], [0, 0, 1, 1], [], []>} : vector<256x256xf32>, vector<256x32xf32>, vector<256x32xf32> -> vector<256x32xf32>
    %c0_15 = arith.constant 0 : index
    %c0_16 = arith.constant 0 : index
    %c0_17 = arith.constant 0 : index
    %14 = vector.load %arg3[%c0_15, %c0_16, %c0_17] : memref<16x16x16xf32, #tpu.memory_space<vmem>>, vector<16x16x16xf32>
    %15 = vector.shape_cast %11 : vector<256x32xf32> to vector<16x16x32xf32>
    "tpu.trace_start"() <{level = 10 : i32, message = "knm,kmo->kno"}> : () -> ()
    %cst_18 = arith.constant dense<0.000000e+00> : vector<16x16x32xf32>
    %16 = tpu.matmul %14, %15, %cst_18 {dimension_numbers = #tpu.dot_dimension_numbers<[2], [1], [1], [2], [0, 0, 0, 1, 1, 2], [0], [0]>} : vector<16x16x16xf32>, vector<16x16x32xf32>, vector<16x16x32xf32> -> vector<16x16x32xf32>
    "tpu.trace_stop"() : () -> ()
    %17 = vector.shape_cast %13 : vector<256x32xf32> to vector<16x16x32xf32>
    %18 = arith.addf %17, %16 : vector<16x16x32xf32>
    %c0_19 = arith.constant 0 : index
    %c0_20 = arith.constant 0 : index
    %19 = vector.load %arg8[%c0_19, %c0_20] : memref<1x32xf32, #tpu.memory_space<vmem>>, vector<1x32xf32>
    %20 = vector.shape_cast %19 : vector<1x32xf32> to vector<1x1x32xf32>
    %21 = vector.broadcast %20 : vector<1x1x32xf32> to vector<16x16x32xf32>
    %22 = arith.addf %18, %21 : vector<16x16x32xf32>
    %cst_21 = arith.constant 0.000000e+00 : f32
    %23 = vector.broadcast %cst_21 : f32 to vector<16x16x32xf32>
    %24 = arith.maximumf %22, %23 : vector<16x16x32xf32>
    %c0_22 = arith.constant 0 : index
    %c0_23 = arith.constant 0 : index
    %c0_24 = arith.constant 0 : index
    %25 = vector.load %arg9[%c0_22, %c0_23, %c0_24] : memref<16x16x32xf32, #tpu.memory_space<vmem>>, vector<16x16x32xf32>
    tpu.vector_store %arg9[%c0_22, %c0_23, %c0_24], %24 {strides = array<i32>} : memref<16x16x32xf32, #tpu.memory_space<vmem>>, vector<16x16x32xf32>,
    return
  }
  func.func @transform_0(%arg0: i32) -> (i32, i32) {
    %c0_i32 = arith.constant 0 : i32
    %c0_i32_0 = arith.constant 0 : i32
    return %arg0, %c0_i32 : i32, i32
  }
  func.func @transform_1(%arg0: i32) -> (i32, i32) {
    %c0_i32 = arith.constant 0 : i32
    %c0_i32_0 = arith.constant 0 : i32
    %c0_i32_1 = arith.constant 0 : i32
    return %c0_i32, %c0_i32_0 : i32, i32
  }
  func.func @transform_2(%arg0: i32) -> (i32, i32, i32) {
    %c0_i32 = arith.constant 0 : i32
    %c0_i32_0 = arith.constant 0 : i32
    %c0_i32_1 = arith.constant 0 : i32
    return %arg0, %c0_i32, %c0_i32_0 : i32, i32, i32
  }
  func.func @transform_3(%arg0: i32) -> (i32, i32) {
    %c0_i32 = arith.constant 0 : i32
    %c0_i32_0 = arith.constant 0 : i32
    %c0_i32_1 = arith.constant 0 : i32
    return %c0_i32, %c0_i32_0 : i32, i32
  }
  func.func @transform_4(%arg0: i32) -> (i32, i32) {
    %c0_i32 = arith.constant 0 : i32
    %c0_i32_0 = arith.constant 0 : i32
    %c0_i32_1 = arith.constant 0 : i32
    return %c0_i32, %c0_i32_0 : i32, i32
  }
  func.func @transform_5(%arg0: i32) -> (i32, i32) {
    %c0_i32 = arith.constant 0 : i32
    %c0_i32_0 = arith.constant 0 : i32
    %c0_i32_1 = arith.constant 0 : i32
    return %c0_i32, %c0_i32_0 : i32, i32
  }
  func.func @transform_6(%arg0: i32) -> (i32, i32) {
    %c0_i32 = arith.constant 0 : i32
    %c0_i32_0 = arith.constant 0 : i32
    %c0_i32_1 = arith.constant 0 : i32
    return %c0_i32, %c0_i32_0 : i32, i32
  }
  func.func @transform_7(%arg0: i32) -> (i32, i32) {
    %c0_i32 = arith.constant 0 : i32
    %c0_i32_0 = arith.constant 0 : i32
    %c0_i32_1 = arith.constant 0 : i32
    return %c0_i32, %c0_i32_0 : i32, i32
  }
  func.func @transform_8(%arg0: i32) -> (i32, i32, i32) {
    %c0_i32 = arith.constant 0 : i32
    %c0_i32_0 = arith.constant 0 : i32
    %c0_i32_1 = arith.constant 0 : i32
    return %arg0, %c0_i32, %c0_i32_0 : i32, i32, i32
  }
}

</mosaic_0001>

<bundles_post_ra>
// kernel: graph_block.1
= control target key start
LH: loop header
LB: loop body
LE: loop exit
PB: predicated region body
PF: predicated region fallthrough
CT: control target
= control target key end

     0   :  { %vm167_vm0 = vcmask 1043456   ;;  %vm70_vm1 = vcmask 31744   ;;  %s4422_s0 = inlined_call_operand.vmem [shape: f32[256,4], index: 0, kind: input, shape index: {}]   ;;  %s4423_s1 = inlined_call_operand.vmem [shape: f32[256,256], index: 1, kind: input, shape index: {}]   ;;  %s4424_s2 = inlined_call_operand.vmem [shape: f32[16,16,16], index: 2, kind: input, shape index: {}]   ;;  %s4425_s3 = inlined_call_operand.vmem [shape: f32[4,64], index: 3, kind: input, shape index: {}]   ;;  %s4426_s4 = inlined_call_operand.vmem [shape: f32[1,64], index: 4, kind: input, shape index: {}]   ;;  %s4427_s5 = inlined_call_operand.vmem [shape: f32[64,32], index: 5, kind: input, shape index: {}]   ;;  %s4428_s6 = inlined_call_operand.vmem [shape: f32[64,32], index: 6, kind: input, shape index: {}]   ;;  %s4429_s7 = inlined_call_operand.vmem [shape: f32[1,32], index: 7, kind: input, shape index: {}]   ;;  %s4430_s8 = inlined_call_operand.hbm [shape: f32[16,16,32], index: 8, kind: output, shape index: {}]  }
   0x1   :  { %v62_v0 = vld [vmem:[%s4425_s3] sm:$0xf]  ;;  %v31_v2 = vld [vmem:[%s4422_s0 + $0x8] sm:$0xff]  ;;  %v32_v3 = vld [vmem:[%s4422_s0 + $0x10] sm:$0xff] }
   0x2   :  { %v30_v1 = vld [vmem:[%s4422_s0] sm:$0xff]  ;;  %3069 = vmatprep.subr.msk.mxu0 %vm167_vm0, %v62_v0  ;;  %v33_v4 = vld [vmem:[%s4422_s0 + $0x18] sm:$0xff]  ;;  %v35_v6 = vld [vmem:[%s4422_s0 + $0x28] sm:$0xff] }
   0x3   :  { %3071 = vmatprep.mubr.msk.f32.mxu0 %vm70_vm1, %v30_v1  ;;  %3070 = vmatpush3.msk.msra.mxu0 %vm167_vm0, %v62_v0  ;;  %v34_v5 = vld [vmem:[%s4422_s0 + $0x20] sm:$0xff]  ;;  %v36_v7 = vld [vmem:[%s4422_s0 + $0x30] sm:$0xff]  ;;  %v37_v8 = vld [vmem:[%s4422_s0 + $0x38] sm:$0xff] }
   0x4   :  { %3072 = vmatmul.mubr.msk.f32.vlgmr.msra.gmra.mrb[0].mxu0 %vm70_vm1, %v31_v2  ;;  %v428_v9 = vld [vmem:[%s4427_s5] sm:$0xff]  ;;  %v429_v10 = vld [vmem:[%s4427_s5 + $0x8] sm:$0xff]  ;;  %v430_v14 = vld [vmem:[%s4427_s5 + $0x10] sm:$0xff] }
   0x5   :  { %3074 = vmatprep.mubr.msk.f32.mxu0 %vm70_vm1, %v32_v3  ;;  %v758_v11 = vld [vmem:[%s4428_s6] sm:$0xff]  ;;  %v3359_v12 = vpack.c.bf16 %v429_v10, %v428_v9  ;;  %v759_v13 = vld [vmem:[%s4428_s6 + $0x8] sm:$0xff]  ;;  %v431_v15 = vld [vmem:[%s4427_s5 + $0x18] sm:$0xff] }
   0x6   :  { %v38_v16 = vld [vmem:[%s4422_s0 + $0x40] sm:$0xff]  ;;  %v3375_v17 = vpack.c.bf16 %v759_v13, %v758_v11  ;;  %v3363_v18 = vpack.c.bf16 %v431_v15, %v430_v14  ;;  %v760_v19 = vld [vmem:[%s4428_s6 + $0x10] sm:$0xff]  ;;  %v761_v20 = vld [vmem:[%s4428_s6 + $0x18] sm:$0xff] }
   0x7   :  { %3360 = vmatprep.subr.bf16.mxu1 %v3359_v12  ;;  %v3379_v21 = vpack.c.bf16 %v761_v20, %v760_v19  ;;  %v432_v22 = vld [vmem:[%s4427_s5 + $0x20] sm:$0xff]  ;;  %v433_v23 = vld [vmem:[%s4427_s5 + $0x28] sm:$0xff] }
   0x8   :  { %3075 = vmatmul.mubr.msk.f32.gmra.mrb[2].mxu0 %vm70_vm1, %v33_v4  ;;  %3376 = vmatprep.subr.bf16.mxu0 %v3375_v17  ;;  %v762_v24 = vld [vmem:[%s4428_s6 + $0x20] sm:$0xff]  ;;  %v763_v25 = vld [vmem:[%s4428_s6 + $0x28] sm:$0xff] }
   0x9   :  { %3077 = vmatprep.mubr.msk.f32.mxu0 %vm70_vm1, %v34_v5 }
   0xc   :  { %3078 = vmatmul.mubr.msk.f32.gmra.mrb[4].mxu0 %vm70_vm1, %v35_v6 }
   0xd   :  { %3080 = vmatprep.mubr.msk.f32.mxu0 %vm70_vm1, %v36_v7 }
  0x10   :  { %3081 = vmatmul.mubr.msk.f32.gmra.mrb[6].mxu0 %vm70_vm1, %v37_v8 }
  0x11   :  { %13 = vsyncpa [#allocation3], 0  ;;  %3083 = vmatprep.mubr.msk.f32.mxu0 %vm70_vm1, %v38_v16  ;;  %v39_v26 = vld [vmem:[%s4422_s0 + $0x48] sm:$0xff]  ;;  %3362 = vmatpush3.bf16.msra.mxu1 %v3359_v12  ;;  %v40_v27 = vld [vmem:[%s4422_s0 + $0x50] sm:$0xff]  ;;  %v3367_v28 = vpack.c.bf16 %v433_v23, %v432_v22  ;;  %v3383_v29 = vpack.c.bf16 %v763_v25, %v762_v24  ;;  %vm436_vm2 = vcmask 523264   ;;  %vm1312_vm3 = vcmask 130048  }
  0x12   :  { %3378 = vmatpush3.bf16.msra.mxu0 %v3375_v17  ;;  %3364 = vmatprep.subr.bf16.mxu1 %v3363_v18  ;;  %v41_v30 = vld [vmem:[%s4422_s0 + $0x58] sm:$0xff]  ;;  %v42_v31 = vld [vmem:[%s4422_s0 + $0x60] sm:$0xff]  ;;  %v43_v32 = vld [vmem:[%s4422_s0 + $0x68] sm:$0xff]  ;;  %vm2712_vm4 = vcmask 261120  }
  0x13   :  { %3380 = vmatprep.subr.bf16.mxu0 %v3379_v21  ;;  %v44_v33 = vld [vmem:[%s4422_s0 + $0x70] sm:$0xff]  ;;  %v45_v34 = vld [vmem:[%s4422_s0 + $0x78] sm:$0xff]  ;;  %v46_v35 = vld [vmem:[%s4422_s0 + $0x80] sm:$0xff] }
  0x14   :  { %3084 = vmatmul.mubr.msk.f32.gmra.mrb[8].mxu0 %vm70_vm1, %v39_v26  ;;  %v47_v36 = vld [vmem:[%s4422_s0 + $0x88] sm:$0xff]  ;;  %v48_v37 = vld [vmem:[%s4422_s0 + $0x90] sm:$0xff]  ;;  %v49_v38 = vld [vmem:[%s4422_s0 + $0x98] sm:$0xff] }
  0x15   :  { %3086 = vmatprep.mubr.msk.f32.mxu0 %vm70_vm1, %v40_v27  ;;  %3366 = vmatpush3.bf16.msra.mxu1 %v3363_v18  ;;  %v50_v39 = vld [vmem:[%s4422_s0 + $0xa0] sm:$0xff]  ;;  %v51_v40 = vld [vmem:[%s4422_s0 + $0xa8] sm:$0xff]  ;;  %v52_v41 = vld [vmem:[%s4422_s0 + $0xb0] sm:$0xff] }
  0x16   :  { %3382 = vmatpush3.bf16.msra.mxu0 %v3379_v21  ;;  %3368 = vmatprep.subr.bf16.mxu1 %v3367_v28  ;;  %v53_v42 = vld [vmem:[%s4422_s0 + $0xb8] sm:$0xff]  ;;  %v54_v43 = vld [vmem:[%s4422_s0 + $0xc0] sm:$0xff]  ;;  %v55_v44 = vld [vmem:[%s4422_s0 + $0xc8] sm:$0xff] }
  0x17   :  { %3384 = vmatprep.subr.bf16.mxu0 %v3383_v29  ;;  %v56_v45 = vld [vmem:[%s4422_s0 + $0xd0] sm:$0xff]  ;;  %v57_v46 = vld [vmem:[%s4422_s0 + $0xd8] sm:$0xff]  ;;  %v58_v47 = vld [vmem:[%s4422_s0 + $0xe0] sm:$0xff] }
  0x18   :  { %3087 = vmatmul.mubr.msk.f32.gmra.mrb[10].mxu0 %vm70_vm1, %v41_v30  ;;  %v59_v48 = vld [vmem:[%s4422_s0 + $0xe8] sm:$0xff]  ;;  %v60_v49 = vld [vmem:[%s4422_s0 + $0xf0] sm:$0xff]  ;;  %v61_v50 = vld [vmem:[%s4422_s0 + $0xf8] sm:$0xff] }
  0x19   :  { %3089 = vmatprep.mubr.msk.f32.mxu0 %vm70_vm1, %v42_v31  ;;  %3370 = vmatpush3.bf16.msra.mxu1 %v3367_v28  ;;  %v434_v51 = vld [vmem:[%s4427_s5 + $0x30] sm:$0xff]  ;;  %v435_v52 = vld [vmem:[%s4427_s5 + $0x38] sm:$0xff]  ;;  %v3794_v57 = vld [vmem:[%s4426_s4] ss:$0 sm:$0xff] }
  0x1a   :  { %3386 = vmatpush3.bf16.msra.mxu0 %v3383_v29  ;;  %v3371_v53 = vpack.c.bf16 %v435_v52, %v434_v51  ;;  %v764_v54 = vld [vmem:[%s4428_s6 + $0x30] sm:$0xff]  ;;  %v765_v55 = vld [vmem:[%s4428_s6 + $0x38] sm:$0xff] }
  0x1b   :  { %v3387_v56 = vpack.c.bf16 %v765_v55, %v764_v54 }
  0x1c   :  { %3090 = vmatmul.mubr.msk.f32.gmra.mrb[12].mxu0 %vm70_vm1, %v43_v32  ;;  %3372 = vmatprep.subr.bf16.mxu1 %v3371_v53 }
  0x1d   :  { %3092 = vmatprep.mubr.msk.f32.mxu0 %vm70_vm1, %v44_v33  ;;  %3388 = vmatprep.subr.bf16.mxu0 %v3387_v56 }
  0x1e   :  { %3374 = vmatpush3.bf16.msra.mxu1 %v3371_v53  ;;  %3390 = vmatpush3.bf16.msra.mxu0 %v3387_v56 }
  0x20   :  { %3093 = vmatmul.mubr.msk.f32.gmra.mrb[14].mxu0 %vm70_vm1, %v45_v34 }
  0x21   :  { %3095 = vmatprep.mubr.msk.f32.mxu0 %vm70_vm1, %v46_v35 }
  0x24   :  { %3096 = vmatmul.mubr.msk.f32.gmra.mrb[16].mxu0 %vm70_vm1, %v47_v36 }
  0x25   :  { %3098 = vmatprep.mubr.msk.f32.mxu0 %vm70_vm1, %v48_v37 }
  0x28   :  { %3099 = vmatmul.mubr.msk.f32.gmra.mrb[18].mxu0 %vm70_vm1, %v49_v38 }
  0x29   :  { %3101 = vmatprep.mubr.msk.f32.mxu0 %vm70_vm1, %v50_v39 }
  0x2c   :  { %3102 = vmatmul.mubr.msk.f32.gmra.mrb[20].mxu0 %vm70_vm1, %v51_v40 }
  0x2d   :  { %3104 = vmatprep.mubr.msk.f32.mxu0 %vm70_vm1, %v52_v41 }
  0x30   :  { %3105 = vmatmul.mubr.msk.f32.gmra.mrb[22].mxu0 %vm70_vm1, %v53_v42 }
  0x31   :  { %3107 = vmatprep.mubr.msk.f32.mxu0 %vm70_vm1, %v54_v43 }
  0x34   :  { %3108 = vmatmul.mubr.msk.f32.gmra.mrb[24].mxu0 %vm70_vm1, %v55_v44 }
  0x35   :  { %3110 = vmatprep.mubr.msk.f32.mxu0 %vm70_vm1, %v56_v45 }
  0x38   :  { %3111 = vmatmul.mubr.msk.f32.gmra.mrb[26].mxu0 %vm70_vm1, %v57_v46 }
  0x39   :  { %3113 = vmatprep.mubr.msk.f32.mxu0 %vm70_vm1, %v58_v47 }
  0x3c   :  { %3114 = vmatmul.mubr.msk.f32.gmra.mrb[28].mxu0 %vm70_vm1, %v59_v48 }
  0x3d   :  { %3116 = vmatprep.mubr.msk.f32.mxu0 %vm70_vm1, %v60_v49 }
  0x40   :  { %3117 = vmatmul.mubr.msk.f32.gmra.mrb[30].mxu0 %vm70_vm1, %v61_v50 }
  0xd7   :  { %v3073_v58 = vpop.f32.mrb[0].mxu0 }
  0xd8   :  { %v243_v59 = vadd.f32 %v3073_v58, %v3794_v57  ;;  %v237_v60 = vpop.f32.mrb[1].mxu0 }
  0xd9   :  { %v238_v61 = vadd.f32 %v3794_v57, %v237_v60 }
  0xda   :  { %v397_v0 = vmax.f32 %v243_v59, 0.0 }
  0xdb   :  { %v396_v62 = vmax.f32 %v238_v61, 0.0  ;;  %v3076_v63 = vpop.f32.mrb[2].mxu0 }
  0xdc   :  { %v253_v1 = vadd.f32 %v3076_v63, %v3794_v57  ;;  %v247_v2 = vpop.f32.mrb[3].mxu0 }
  0xdd   :  { %v248_v3 = vadd.f32 %v3794_v57, %v247_v2  ;;  %3135 = vmatprep.mubr.msk.f32.mxu1 %vm436_vm2, %v396_v62  ;;  %3199 = vmatprep.mubr.msk.f32.mxu0 %vm436_vm2, %v396_v62 }
  0xde   :  { %3136 = vmatmul.mubr.msk.f32.vlgmr.msra.gmra.mrb[0].mxu1 %vm436_vm2, %v397_v0  ;;  %3200 = vmatmul.mubr.msk.f32.vlgmr.msra.gmra.mrb[32].mxu0 %vm436_vm2, %v397_v0  ;;  %v399_v6 = vmax.f32 %v253_v1, 0.0 }
  0xdf   :  { %v398_v4 = vmax.f32 %v248_v3, 0.0  ;;  %v3079_v5 = vpop.f32.mrb[4].mxu0 }
  0xe0   :  { %v263_v7 = vadd.f32 %v3079_v5, %v3794_v57  ;;  %v257_v8 = vpop.f32.mrb[5].mxu0 }
  0xe1   :  { %v258_v9 = vadd.f32 %v3794_v57, %v257_v8  ;;  %3138 = vmatprep.mubr.msk.f32.mxu1 %vm436_vm2, %v398_v4  ;;  %3202 = vmatprep.mubr.msk.f32.mxu0 %vm436_vm2, %v398_v4 }
  0xe2   :  { %3139 = vmatmul.mubr.msk.f32.gmra.mrb[2].mxu1 %vm436_vm2, %v399_v6  ;;  %3203 = vmatmul.mubr.msk.f32.gmra.mrb[34].mxu0 %vm436_vm2, %v399_v6  ;;  %v401_v12 = vmax.f32 %v263_v7, 0.0 }
  0xe3   :  { %v400_v10 = vmax.f32 %v258_v9, 0.0  ;;  %v3082_v11 = vpop.f32.mrb[6].mxu0 }
  0xe4   :  { %v273_v13 = vadd.f32 %v3082_v11, %v3794_v57  ;;  %v267_v14 = vpop.f32.mrb[7].mxu0 }
  0xe5   :  { %v268_v15 = vadd.f32 %v3794_v57, %v267_v14  ;;  %3141 = vmatprep.mubr.msk.f32.mxu1 %vm436_vm2, %v400_v10  ;;  %3205 = vmatprep.mubr.msk.f32.mxu0 %vm436_vm2, %v400_v10 }
  0xe6   :  { %3142 = vmatmul.mubr.msk.f32.gmra.mrb[4].mxu1 %vm436_vm2, %v401_v12  ;;  %3206 = vmatmul.mubr.msk.f32.gmra.mrb[36].mxu0 %vm436_vm2, %v401_v12  ;;  %v403_v18 = vmax.f32 %v273_v13, 0.0 }
  0xe7   :  { %v402_v16 = vmax.f32 %v268_v15, 0.0  ;;  %v3085_v17 = vpop.f32.mrb[8].mxu0 }
  0xe8   :  { %v283_v19 = vadd.f32 %v3085_v17, %v3794_v57  ;;  %v277_v20 = vpop.f32.mrb[9].mxu0 }
  0xe9   :  { %v278_v21 = vadd.f32 %v3794_v57, %v277_v20  ;;  %3144 = vmatprep.mubr.msk.f32.mxu1 %vm436_vm2, %v402_v16  ;;  %3208 = vmatprep.mubr.msk.f32.mxu0 %vm436_vm2, %v402_v16 }
  0xea   :  { %3145 = vmatmul.mubr.msk.f32.gmra.mrb[6].mxu1 %vm436_vm2, %v403_v18  ;;  %3209 = vmatmul.mubr.msk.f32.gmra.mrb[38].mxu0 %vm436_vm2, %v403_v18  ;;  %v405_v24 = vmax.f32 %v283_v19, 0.0 }
  0xeb   :  { %v404_v22 = vmax.f32 %v278_v21, 0.0  ;;  %v3088_v23 = vpop.f32.mrb[10].mxu0 }
  0xec   :  { %v293_v25 = vadd.f32 %v3088_v23, %v3794_v57  ;;  %v287_v26 = vpop.f32.mrb[11].mxu0 }
  0xed   :  { %v288_v27 = vadd.f32 %v3794_v57, %v287_v26  ;;  %3147 = vmatprep.mubr.msk.f32.mxu1 %vm436_vm2, %v404_v22  ;;  %3211 = vmatprep.mubr.msk.f32.mxu0 %vm436_vm2, %v404_v22 }
  0xee   :  { %3148 = vmatmul.mubr.msk.f32.gmra.mrb[8].mxu1 %vm436_vm2, %v405_v24  ;;  %3212 = vmatmul.mubr.msk.f32.gmra.mrb[40].mxu0 %vm436_vm2, %v405_v24  ;;  %v407_v30 = vmax.f32 %v293_v25, 0.0 }
  0xef   :  { %v406_v28 = vmax.f32 %v288_v27, 0.0  ;;  %v3091_v29 = vpop.f32.mrb[12].mxu0  ;;  %v3563_v27 = vmov 0.0|0.0  }
  0xf0   :  { %v303_v31 = vadd.f32 %v3091_v29, %v3794_v57  ;;  %v297_v32 = vpop.f32.mrb[13].mxu0  ;;  %3391 = vmatprep.subr.bf16.mxu0 %v3563_v27  ;;  %3503 = vmatprep.subr.bf16.mxu1 %v3563_v27 }
  0xf1   :  { %v298_v33 = vadd.f32 %v3794_v57, %v297_v32  ;;  %3150 = vmatprep.mubr.msk.f32.mxu1 %vm436_vm2, %v406_v28  ;;  %3214 = vmatprep.mubr.msk.f32.mxu0 %vm436_vm2, %v406_v28  ;;  %v994_v28 = vld [vmem:[%s4423_s1 + $0x18] sm:$0xff] }
  0xf2   :  { %3151 = vmatmul.mubr.msk.f32.gmra.mrb[10].mxu1 %vm436_vm2, %v407_v30  ;;  %3215 = vmatmul.mubr.msk.f32.gmra.mrb[42].mxu0 %vm436_vm2, %v407_v30  ;;  %v409_v36 = vmax.f32 %v303_v31, 0.0 }
  0xf3   :  { %v408_v34 = vmax.f32 %v298_v33, 0.0  ;;  %v3094_v35 = vpop.f32.mrb[14].mxu0 }
  0xf4   :  { %v313_v37 = vadd.f32 %v3094_v35, %v3794_v57  ;;  %v307_v38 = vpop.f32.mrb[15].mxu0 }
  0xf5   :  { %v308_v39 = vadd.f32 %v3794_v57, %v307_v38  ;;  %3153 = vmatprep.mubr.msk.f32.mxu1 %vm436_vm2, %v408_v34  ;;  %3217 = vmatprep.mubr.msk.f32.mxu0 %vm436_vm2, %v408_v34 }
  0xf6   :  { %3154 = vmatmul.mubr.msk.f32.gmra.mrb[12].mxu1 %vm436_vm2, %v409_v36  ;;  %3218 = vmatmul.mubr.msk.f32.gmra.mrb[44].mxu0 %vm436_vm2, %v409_v36  ;;  %v411_v42 = vmax.f32 %v313_v37, 0.0 }
  0xf7   :  { %v410_v40 = vmax.f32 %v308_v39, 0.0  ;;  %v3097_v41 = vpop.f32.mrb[16].mxu0 }
  0xf8   :  { %v323_v43 = vadd.f32 %v3097_v41, %v3794_v57  ;;  %v317_v44 = vpop.f32.mrb[17].mxu0 }
  0xf9   :  { %v318_v45 = vadd.f32 %v3794_v57, %v317_v44  ;;  %3156 = vmatprep.mubr.msk.f32.mxu1 %vm436_vm2, %v410_v40  ;;  %3220 = vmatprep.mubr.msk.f32.mxu0 %vm436_vm2, %v410_v40 }
  0xfa   :  { %3157 = vmatmul.mubr.msk.f32.gmra.mrb[14].mxu1 %vm436_vm2, %v411_v42  ;;  %3221 = vmatmul.mubr.msk.f32.gmra.mrb[46].mxu0 %vm436_vm2, %v411_v42  ;;  %v413_v48 = vmax.f32 %v323_v43, 0.0 }
  0xfb   :  { %v412_v46 = vmax.f32 %v318_v45, 0.0  ;;  %v3100_v47 = vpop.f32.mrb[18].mxu0 }
  0xfc   :  { %v333_v49 = vadd.f32 %v3100_v47, %v3794_v57  ;;  %v327_v50 = vpop.f32.mrb[19].mxu0 }
  0xfd   :  { %v328_v51 = vadd.f32 %v3794_v57, %v327_v50  ;;  %3159 = vmatprep.mubr.msk.f32.mxu1 %vm436_vm2, %v412_v46  ;;  %3223 = vmatprep.mubr.msk.f32.mxu0 %vm436_vm2, %v412_v46 }
  0xfe   :  { %3160 = vmatmul.mubr.msk.f32.gmra.mrb[16].mxu1 %vm436_vm2, %v413_v48  ;;  %3224 = vmatmul.mubr.msk.f32.gmra.mrb[48].mxu0 %vm436_vm2, %v413_v48  ;;  %v415_v54 = vmax.f32 %v333_v49, 0.0 }
  0xff   :  { %v414_v52 = vmax.f32 %v328_v51, 0.0  ;;  %v3103_v53 = vpop.f32.mrb[20].mxu0 }
 0x100   :  { %v343_v55 = vadd.f32 %v3103_v53, %v3794_v57  ;;  %v337_v56 = vpop.f32.mrb[21].mxu0 }
 0x101   :  { %v338_v58 = vadd.f32 %v3794_v57, %v337_v56  ;;  %3162 = vmatprep.mubr.msk.f32.mxu1 %vm436_vm2, %v414_v52  ;;  %3226 = vmatprep.mubr.msk.f32.mxu0 %vm436_vm2, %v414_v52 }
 0x102   :  { %3163 = vmatmul.mubr.msk.f32.gmra.mrb[18].mxu1 %vm436_vm2, %v415_v54  ;;  %3227 = vmatmul.mubr.msk.f32.gmra.mrb[50].mxu0 %vm436_vm2, %v415_v54  ;;  %v417_v61 = vmax.f32 %v343_v55, 0.0 }
 0x103   :  { %v416_v59 = vmax.f32 %v338_v58, 0.0  ;;  %v3106_v60 = vpop.f32.mrb[22].mxu0 }
 0x104   :  { %v353_v62 = vadd.f32 %v3106_v60, %v3794_v57  ;;  %v347_v63 = vpop.f32.mrb[23].mxu0 }
 0x105   :  { %v348_v0 = vadd.f32 %v3794_v57, %v347_v63  ;;  %3165 = vmatprep.mubr.msk.f32.mxu1 %vm436_vm2, %v416_v59  ;;  %3229 = vmatprep.mubr.msk.f32.mxu0 %vm436_vm2, %v416_v59 }
 0x106   :  { %3166 = vmatmul.mubr.msk.f32.gmra.mrb[20].mxu1 %vm436_vm2, %v417_v61  ;;  %3230 = vmatmul.mubr.msk.f32.gmra.mrb[52].mxu0 %vm436_vm2, %v417_v61  ;;  %v419_v3 = vmax.f32 %v353_v62, 0.0 }
 0x107   :  { %v418_v1 = vmax.f32 %v348_v0, 0.0  ;;  %v3109_v2 = vpop.f32.mrb[24].mxu0 }
 0x108   :  { %v363_v4 = vadd.f32 %v3109_v2, %v3794_v57  ;;  %v357_v5 = vpop.f32.mrb[25].mxu0 }
 0x109   :  { %v358_v6 = vadd.f32 %v3794_v57, %v357_v5  ;;  %3168 = vmatprep.mubr.msk.f32.mxu1 %vm436_vm2, %v418_v1  ;;  %3232 = vmatprep.mubr.msk.f32.mxu0 %vm436_vm2, %v418_v1 }
 0x10a   :  { %3169 = vmatmul.mubr.msk.f32.gmra.mrb[22].mxu1 %vm436_vm2, %v419_v3  ;;  %3233 = vmatmul.mubr.msk.f32.gmra.mrb[54].mxu0 %vm436_vm2, %v419_v3  ;;  %v421_v9 = vmax.f32 %v363_v4, 0.0 }
 0x10b   :  { %v420_v7 = vmax.f32 %v358_v6, 0.0  ;;  %v3112_v8 = vpop.f32.mrb[26].mxu0 }
 0x10c   :  { %v373_v10 = vadd.f32 %v3112_v8, %v3794_v57  ;;  %v367_v11 = vpop.f32.mrb[27].mxu0 }
 0x10d   :  { %v368_v12 = vadd.f32 %v3794_v57, %v367_v11  ;;  %3171 = vmatprep.mubr.msk.f32.mxu1 %vm436_vm2, %v420_v7  ;;  %3235 = vmatprep.mubr.msk.f32.mxu0 %vm436_vm2, %v420_v7 }
 0x10e   :  { %3172 = vmatmul.mubr.msk.f32.gmra.mrb[24].mxu1 %vm436_vm2, %v421_v9  ;;  %3236 = vmatmul.mubr.msk.f32.gmra.mrb[56].mxu0 %vm436_vm2, %v421_v9  ;;  %v423_v15 = vmax.f32 %v373_v10, 0.0 }
 0x10f   :  { %v422_v13 = vmax.f32 %v368_v12, 0.0  ;;  %v3115_v14 = vpop.f32.mrb[28].mxu0 }
 0x110   :  { %v383_v16 = vadd.f32 %v3115_v14, %v3794_v57  ;;  %v377_v17 = vpop.f32.mrb[29].mxu0 }
 0x111   :  { %v378_v18 = vadd.f32 %v3794_v57, %v377_v17  ;;  %3174 = vmatprep.mubr.msk.f32.mxu1 %vm436_vm2, %v422_v13  ;;  %3238 = vmatprep.mubr.msk.f32.mxu0 %vm436_vm2, %v422_v13 }
 0x112   :  { %3175 = vmatmul.mubr.msk.f32.gmra.mrb[26].mxu1 %vm436_vm2, %v423_v15  ;;  %3239 = vmatmul.mubr.msk.f32.gmra.mrb[58].mxu0 %vm436_vm2, %v423_v15  ;;  %v425_v21 = vmax.f32 %v383_v16, 0.0 }
 0x113   :  { %v424_v19 = vmax.f32 %v378_v18, 0.0  ;;  %v3118_v20 = vpop.f32.mrb[30].mxu0 }
 0x114   :  { %v393_v22 = vadd.f32 %v3118_v20, %v3794_v57  ;;  %v387_v23 = vpop.f32.mrb[31].mxu0 }
 0x115   :  { %v388_v24 = vadd.f32 %v3794_v57, %v387_v23  ;;  %3177 = vmatprep.mubr.msk.f32.mxu1 %vm436_vm2, %v424_v19  ;;  %3241 = vmatprep.mubr.msk.f32.mxu0 %vm436_vm2, %v424_v19  ;;  %v992_v57 = vld [vmem:[%s4423_s1 + $0x8] sm:$0xff] }
 0x116   :  { %3178 = vmatmul.mubr.msk.f32.gmra.mrb[28].mxu1 %vm436_vm2, %v425_v21  ;;  %3242 = vmatmul.mubr.msk.f32.gmra.mrb[60].mxu0 %vm436_vm2, %v425_v21  ;;  %v427_v26 = vmax.f32 %v393_v22, 0.0 }
 0x117   :  { %v426_v25 = vmax.f32 %v388_v24, 0.0 }
 0x119   :  { %3180 = vmatprep.mubr.msk.f32.mxu1 %vm436_vm2, %v426_v25  ;;  %3244 = vmatprep.mubr.msk.f32.mxu0 %vm436_vm2, %v426_v25 }
 0x11a   :  { %3181 = vmatmul.mubr.msk.f32.gmra.mrb[30].mxu1 %vm436_vm2, %v427_v26  ;;  %3245 = vmatmul.mubr.msk.f32.gmra.mrb[62].mxu0 %vm436_vm2, %v427_v26 }
 0x11b   :  { %1119 = vmatprep.mubr.f32.mxu0 %v992_v57  ;;  %1124 = vmatprep.mubr.f32.mxu1 %v994_v28 }
 0x1b1   :  { %v3137_v29 = vpop.f32.mrb[0].mxu1  ;;  %v3201_v30 = vpop.f32.mrb[32].mxu0 }
 0x1b2   :  { %v599_v31 = vpop.f32.mrb[1].mxu1  ;;  %v832_v32 = vpop.f32.mrb[33].mxu0 }
 0x1b3   :  { %v3392_v33 = vpack.c.bf16 %v3137_v29, %v599_v31  ;;  %v3900_v34 = vpack.c.bf16 %v3201_v30, %v832_v32 }
 0x1b5   :  { %v3140_v35 = vpop.f32.mrb[2].mxu1  ;;  %v3204_v36 = vpop.f32.mrb[34].mxu0  ;;  %3393 = vmatpush1.bf16.msra.mxu0 %v3392_v33  ;;  %3519 = vmatpush1.bf16.msra.mxu1 %v3392_v33 }
 0x1b6   :  { %v609_v37 = vpop.f32.mrb[3].mxu1  ;;  %v842_v38 = vpop.f32.mrb[35].mxu0  ;;  %3394 = vmatprep.subr.bf16.mxu0 %v3563_v27  ;;  %3504 = vmatprep.subr.bf16.mxu1 %v3563_v27 }
 0x1b7   :  { %v3395_v39 = vpack.c.bf16 %v3140_v35, %v609_v37  ;;  %v3904_v40 = vpack.c.bf16 %v3204_v36, %v842_v38 }
 0x1b9   :  { %v3143_v41 = vpop.f32.mrb[4].mxu1  ;;  %v3207_v42 = vpop.f32.mrb[36].mxu0  ;;  %3396 = vmatpush1.bf16.msra.mxu0 %v3395_v39  ;;  %3520 = vmatpush1.bf16.msra.mxu1 %v3395_v39 }
 0x1ba   :  { %v619_v43 = vpop.f32.mrb[5].mxu1  ;;  %v852_v44 = vpop.f32.mrb[37].mxu0  ;;  %3397 = vmatprep.subr.bf16.mxu0 %v3563_v27  ;;  %3505 = vmatprep.subr.bf16.mxu1 %v3563_v27 }
 0x1bb   :  { %v3398_v45 = vpack.c.bf16 %v3143_v41, %v619_v43  ;;  %v3908_v46 = vpack.c.bf16 %v3207_v42, %v852_v44 }
 0x1bd   :  { %v3146_v47 = vpop.f32.mrb[6].mxu1  ;;  %v3210_v48 = vpop.f32.mrb[38].mxu0  ;;  %3399 = vmatpush1.bf16.msra.mxu0 %v3398_v45  ;;  %3521 = vmatpush1.bf16.msra.mxu1 %v3398_v45 }
 0x1be   :  { %v629_v49 = vpop.f32.mrb[7].mxu1  ;;  %v862_v50 = vpop.f32.mrb[39].mxu0  ;;  %3400 = vmatprep.subr.bf16.mxu0 %v3563_v27  ;;  %3506 = vmatprep.subr.bf16.mxu1 %v3563_v27 }
 0x1bf   :  { %v3401_v51 = vpack.c.bf16 %v3146_v47, %v629_v49  ;;  %v3912_v52 = vpack.c.bf16 %v3210_v48, %v862_v50 }
 0x1c1   :  { %v3149_v53 = vpop.f32.mrb[8].mxu1  ;;  %v3213_v54 = vpop.f32.mrb[40].mxu0  ;;  %3402 = vmatpush1.bf16.msra.mxu0 %v3401_v51  ;;  %3522 = vmatpush1.bf16.msra.mxu1 %v3401_v51 }
 0x1c2   :  { %v639_v55 = vpop.f32.mrb[9].mxu1  ;;  %v872_v56 = vpop.f32.mrb[41].mxu0  ;;  %3403 = vmatprep.subr.bf16.mxu0 %v3563_v27  ;;  %3507 = vmatprep.subr.bf16.mxu1 %v3563_v27 }
 0x1c3   :  { %v3404_v58 = vpack.c.bf16 %v3149_v53, %v639_v55  ;;  %v3916_v59 = vpack.c.bf16 %v3213_v54, %v872_v56 }
 0x1c5   :  { %v3152_v60 = vpop.f32.mrb[10].mxu1  ;;  %v3216_v61 = vpop.f32.mrb[42].mxu0  ;;  %3405 = vmatpush1.bf16.msra.mxu0 %v3404_v58  ;;  %3523 = vmatpush1.bf16.msra.mxu1 %v3404_v58 }
 0x1c6   :  { %v649_v62 = vpop.f32.mrb[11].mxu1  ;;  %v882_v63 = vpop.f32.mrb[43].mxu0  ;;  %3406 = vmatprep.subr.bf16.mxu0 %v3563_v27  ;;  %3508 = vmatprep.subr.bf16.mxu1 %v3563_v27 }
 0x1c7   :  { %v3407_v0 = vpack.c.bf16 %v3152_v60, %v649_v62  ;;  %v3920_v1 = vpack.c.bf16 %v3216_v61, %v882_v63 }
 0x1c9   :  { %v3155_v2 = vpop.f32.mrb[12].mxu1  ;;  %v3219_v3 = vpop.f32.mrb[44].mxu0  ;;  %3408 = vmatpush1.bf16.msra.mxu0 %v3407_v0  ;;  %3524 = vmatpush1.bf16.msra.mxu1 %v3407_v0 }
 0x1ca   :  { %v659_v4 = vpop.f32.mrb[13].mxu1  ;;  %v892_v5 = vpop.f32.mrb[45].mxu0  ;;  %3409 = vmatprep.subr.bf16.mxu0 %v3563_v27  ;;  %3509 = vmatprep.subr.bf16.mxu1 %v3563_v27 }
 0x1cb   :  { %v3410_v6 = vpack.c.bf16 %v3155_v2, %v659_v4  ;;  %v3924_v7 = vpack.c.bf16 %v3219_v3, %v892_v5  ;;  %v991_v5 = vld [vmem:[%s4423_s1] sm:$0xff] }
 0x1cd   :  { %v3158_v8 = vpop.f32.mrb[14].mxu1  ;;  %v3222_v9 = vpop.f32.mrb[46].mxu0  ;;  %3411 = vmatpush1.bf16.msra.mxu0 %v3410_v6  ;;  %3525 = vmatpush1.bf16.msra.mxu1 %v3410_v6  ;;  %v993_v6 = vld [vmem:[%s4423_s1 + $0x10] sm:$0xff] }
 0x1ce   :  { %v669_v10 = vpop.f32.mrb[15].mxu1  ;;  %v902_v11 = vpop.f32.mrb[47].mxu0  ;;  %3412 = vmatprep.subr.bf16.mxu0 %v3563_v27  ;;  %3510 = vmatprep.subr.bf16.mxu1 %v3563_v27 }
 0x1cf   :  { %v3413_v12 = vpack.c.bf16 %v3158_v8, %v669_v10  ;;  %v3928_v13 = vpack.c.bf16 %v3222_v9, %v902_v11  ;;  %v996_v8 = vld [vmem:[%s4423_s1 + $0x28] sm:$0xff]  ;;  %v995_v9 = vld [vmem:[%s4423_s1 + $0x20] sm:$0xff]  ;;  %v998_v11 = vld [vmem:[%s4423_s1 + $0x38] sm:$0xff] }
 0x1d0   :  { %v1281_v10 = vld [vmem:[%s4424_s2 + $0x8] sm:$0xff] }
 0x1d1   :  { %v3161_v14 = vpop.f32.mrb[16].mxu1  ;;  %v3225_v15 = vpop.f32.mrb[48].mxu0  ;;  %3414 = vmatpush1.bf16.msra.mxu0 %v3413_v12  ;;  %3526 = vmatpush1.bf16.msra.mxu1 %v3413_v12  ;;  %v997_v12 = vld [vmem:[%s4423_s1 + $0x30] sm:$0xff] }
 0x1d2   :  { %v679_v16 = vpop.f32.mrb[17].mxu1  ;;  %v912_v17 = vpop.f32.mrb[49].mxu0  ;;  %3415 = vmatprep.subr.bf16.mxu0 %v3563_v27  ;;  %3511 = vmatprep.subr.bf16.mxu1 %v3563_v27 }
 0x1d3   :  { %v3416_v18 = vpack.c.bf16 %v3161_v14, %v679_v16  ;;  %v3932_v19 = vpack.c.bf16 %v3225_v15, %v912_v17  ;;  %v1283_v14 = vld [vmem:[%s4424_s2 + $0x18] sm:$0xff]  ;;  %v1000_v15 = vld [vmem:[%s4423_s1 + $0x48] sm:$0xff]  ;;  %v999_v16 = vld [vmem:[%s4423_s1 + $0x40] sm:$0xff] }
 0x1d4   :  { %v1285_v17 = vld [vmem:[%s4424_s2 + $0x28] sm:$0xff] }
 0x1d5   :  { %v3164_v20 = vpop.f32.mrb[18].mxu1  ;;  %v3228_v21 = vpop.f32.mrb[50].mxu0  ;;  %3417 = vmatpush1.bf16.msra.mxu0 %v3416_v18  ;;  %3527 = vmatpush1.bf16.msra.mxu1 %v3416_v18  ;;  %v1002_v18 = vld [vmem:[%s4423_s1 + $0x58] sm:$0xff] }
 0x1d6   :  { %v689_v22 = vpop.f32.mrb[19].mxu1  ;;  %v922_v23 = vpop.f32.mrb[51].mxu0  ;;  %3418 = vmatprep.subr.bf16.mxu0 %v3563_v27  ;;  %3512 = vmatprep.subr.bf16.mxu1 %v3563_v27 }
 0x1d7   :  { %v3419_v24 = vpack.c.bf16 %v3164_v20, %v689_v22  ;;  %v3936_v25 = vpack.c.bf16 %v3228_v21, %v922_v23  ;;  %v1001_v20 = vld [vmem:[%s4423_s1 + $0x50] sm:$0xff]  ;;  %v1287_v21 = vld [vmem:[%s4424_s2 + $0x38] sm:$0xff]  ;;  %v1004_v22 = vld [vmem:[%s4423_s1 + $0x68] sm:$0xff] }
 0x1d8   :  { %v1003_v23 = vld [vmem:[%s4423_s1 + $0x60] sm:$0xff] }
 0x1d9   :  { %v3167_v26 = vpop.f32.mrb[20].mxu1  ;;  %v3231_v57 = vpop.f32.mrb[52].mxu0  ;;  %3420 = vmatpush1.bf16.msra.mxu0 %v3419_v24  ;;  %3528 = vmatpush1.bf16.msra.mxu1 %v3419_v24  ;;  %v1289_v24 = vld [vmem:[%s4424_s2 + $0x48] sm:$0xff] }
 0x1da   :  { %v699_v28 = vpop.f32.mrb[21].mxu1  ;;  %v932_v29 = vpop.f32.mrb[53].mxu0  ;;  %3421 = vmatprep.subr.bf16.mxu0 %v3563_v27  ;;  %3513 = vmatprep.subr.bf16.mxu1 %v3563_v27 }
 0x1db   :  { %v3422_v30 = vpack.c.bf16 %v3167_v26, %v699_v28  ;;  %v3940_v31 = vpack.c.bf16 %v3231_v57, %v932_v29  ;;  %v1006_v26 = vld [vmem:[%s4423_s1 + $0x78] sm:$0xff]  ;;  %v1005_v57 = vld [vmem:[%s4423_s1 + $0x70] sm:$0xff]  ;;  %v1008_v29 = vld [vmem:[%s4423_s1 + $0x88] sm:$0xff] }
 0x1dc   :  { %v1291_v28 = vld [vmem:[%s4424_s2 + $0x58] sm:$0xff] }
 0x1dd   :  { %v3170_v32 = vpop.f32.mrb[22].mxu1  ;;  %v3234_v33 = vpop.f32.mrb[54].mxu0  ;;  %3423 = vmatpush1.bf16.msra.mxu0 %v3422_v30  ;;  %3529 = vmatpush1.bf16.msra.mxu1 %v3422_v30  ;;  %v1007_v30 = vld [vmem:[%s4423_s1 + $0x80] sm:$0xff] }
 0x1de   :  { %v709_v35 = vpop.f32.mrb[23].mxu1  ;;  %v942_v36 = vpop.f32.mrb[55].mxu0  ;;  %3424 = vmatprep.subr.bf16.mxu0 %v3563_v27  ;;  %3514 = vmatprep.subr.bf16.mxu1 %v3563_v27 }
 0x1df   :  { %v3425_v37 = vpack.c.bf16 %v3170_v32, %v709_v35  ;;  %v3944_v38 = vpack.c.bf16 %v3234_v33, %v942_v36  ;;  %v1293_v32 = vld [vmem:[%s4424_s2 + $0x68] sm:$0xff]  ;;  %v1010_v33 = vld [vmem:[%s4423_s1 + $0x98] sm:$0xff]  ;;  %v1009_v35 = vld [vmem:[%s4423_s1 + $0x90] sm:$0xff] }
 0x1e0   :  { %v1295_v36 = vld [vmem:[%s4424_s2 + $0x78] sm:$0xff] }
 0x1e1   :  { %v3173_v39 = vpop.f32.mrb[24].mxu1  ;;  %v3237_v41 = vpop.f32.mrb[56].mxu0  ;;  %3426 = vmatpush1.bf16.msra.mxu0 %v3425_v37  ;;  %3530 = vmatpush1.bf16.msra.mxu1 %v3425_v37  ;;  %v1012_v37 = vld [vmem:[%s4423_s1 + $0xa8] sm:$0xff] }
 0x1e2   :  { %v719_v42 = vpop.f32.mrb[25].mxu1  ;;  %v952_v43 = vpop.f32.mrb[57].mxu0  ;;  %3427 = vmatprep.subr.bf16.mxu0 %v3563_v27  ;;  %3515 = vmatprep.subr.bf16.mxu1 %v3563_v27 }
 0x1e3   :  { %v3428_v44 = vpack.c.bf16 %v3173_v39, %v719_v42  ;;  %v3948_v45 = vpack.c.bf16 %v3237_v41, %v952_v43  ;;  %v1011_v39 = vld [vmem:[%s4423_s1 + $0xa0] sm:$0xff]  ;;  %v1297_v41 = vld [vmem:[%s4424_s2 + $0x88] sm:$0xff]  ;;  %v1014_v42 = vld [vmem:[%s4423_s1 + $0xb8] sm:$0xff] }
 0x1e4   :  { %v1013_v43 = vld [vmem:[%s4423_s1 + $0xb0] sm:$0xff] }
 0x1e5   :  { %v3176_v47 = vpop.f32.mrb[26].mxu1  ;;  %v3240_v48 = vpop.f32.mrb[58].mxu0  ;;  %3429 = vmatpush1.bf16.msra.mxu0 %v3428_v44  ;;  %3531 = vmatpush1.bf16.msra.mxu1 %v3428_v44  ;;  %v1299_v44 = vld [vmem:[%s4424_s2 + $0x98] sm:$0xff] }
 0x1e6   :  { %v729_v49 = vpop.f32.mrb[27].mxu1  ;;  %v962_v50 = vpop.f32.mrb[59].mxu0  ;;  %3430 = vmatprep.subr.bf16.mxu0 %v3563_v27  ;;  %3516 = vmatprep.subr.bf16.mxu1 %v3563_v27 }
 0x1e7   :  { %v3431_v51 = vpack.c.bf16 %v3176_v47, %v729_v49  ;;  %v3952_v53 = vpack.c.bf16 %v3240_v48, %v962_v50  ;;  %v1016_v47 = vld [vmem:[%s4423_s1 + $0xc8] sm:$0xff]  ;;  %v1015_v48 = vld [vmem:[%s4423_s1 + $0xc0] sm:$0xff]  ;;  %v1018_v50 = vld [vmem:[%s4423_s1 + $0xd8] sm:$0xff] }
 0x1e8   :  { %v1301_v49 = vld [vmem:[%s4424_s2 + $0xa8] sm:$0xff] }
 0x1e9   :  { %v3179_v54 = vpop.f32.mrb[28].mxu1  ;;  %v3243_v55 = vpop.f32.mrb[60].mxu0  ;;  %3432 = vmatpush1.bf16.msra.mxu0 %v3431_v51  ;;  %3532 = vmatpush1.bf16.msra.mxu1 %v3431_v51  ;;  %v1017_v51 = vld [vmem:[%s4423_s1 + $0xd0] sm:$0xff] }
 0x1ea   :  { %v739_v56 = vpop.f32.mrb[29].mxu1  ;;  %v972_v58 = vpop.f32.mrb[61].mxu0  ;;  %3433 = vmatprep.subr.bf16.mxu0 %v3563_v27  ;;  %3517 = vmatprep.subr.bf16.mxu1 %v3563_v27 }
 0x1eb   :  { %v3434_v60 = vpack.c.bf16 %v3179_v54, %v739_v56  ;;  %v3956_v61 = vpack.c.bf16 %v3243_v55, %v972_v58  ;;  %v1303_v54 = vld [vmem:[%s4424_s2 + $0xb8] sm:$0xff]  ;;  %v1020_v55 = vld [vmem:[%s4423_s1 + $0xe8] sm:$0xff]  ;;  %v1019_v56 = vld [vmem:[%s4423_s1 + $0xe0] sm:$0xff] }
 0x1ec   :  { %v1305_v58 = vld [vmem:[%s4424_s2 + $0xc8] sm:$0xff] }
 0x1ed   :  { %v3182_v62 = vpop.f32.mrb[30].mxu1  ;;  %v3246_v63 = vpop.f32.mrb[62].mxu0  ;;  %3435 = vmatpush1.bf16.msra.mxu0 %v3434_v60  ;;  %3533 = vmatpush1.bf16.msra.mxu1 %v3434_v60  ;;  %v1022_v60 = vld [vmem:[%s4423_s1 + $0xf8] sm:$0xff] }
 0x1ee   :  { %v749_v0 = vpop.f32.mrb[31].mxu1  ;;  %v982_v2 = vpop.f32.mrb[63].mxu0  ;;  %3436 = vmatprep.subr.bf16.mxu0 %v3563_v27  ;;  %3518 = vmatprep.subr.bf16.mxu1 %v3563_v27  ;;  %v1280_v27 = vld [vmem:[%s4424_s2] sm:$0xff] }
 0x1ef   :  { %v3437_v3 = vpack.c.bf16 %v3182_v62, %v749_v0  ;;  %v3960_v4 = vpack.c.bf16 %v3246_v63, %v982_v2  ;;  %v1021_v62 = vld [vmem:[%s4423_s1 + $0xf0] sm:$0xff]  ;;  %v1307_v63 = vld [vmem:[%s4424_s2 + $0xd8] sm:$0xff]  ;;  %v1024_v0 = vld [vmem:[%s4423_s1 + $0x108] sm:$0xff] }
 0x1f0   :  { %v1023_v2 = vld [vmem:[%s4423_s1 + $0x100] sm:$0xff] }
 0x1f1   :  { %3438 = vmatpush1.bf16.msra.mxu0 %v3437_v3  ;;  %3534 = vmatpush1.bf16.msra.mxu1 %v3437_v3  ;;  %v1309_v3 = vld [vmem:[%s4424_s2 + $0xe8] sm:$0xff] }
 0x1f2   :  { %3440 = vmatprep.subr.bf16.mxu0 %v3900_v34 }
 0x1f4   :  { %1120 = vmatmul.mubr.f32.vlgmr.msra.gmra.mrb[64].mxu0 %v991_v5  ;;  %1125 = vmatmul.mubr.f32.vlgmr.msra.gmra.mrb[32].mxu1 %v993_v6  ;;  %v1026_v5 = vld [vmem:[%s4423_s1 + $0x118] sm:$0xff]  ;;  %v1025_v6 = vld [vmem:[%s4423_s1 + $0x110] sm:$0xff] }
 0x1f5   :  { %3442 = vmatpush3.bf16.msra.mxu0 %v3900_v34  ;;  %1129 = vmatprep.mubr.f32.mxu1 %v996_v8  ;;  %v1282_v34 = vld [vmem:[%s4424_s2 + $0x10] sm:$0xff]  ;;  %v1311_v8 = vld [vmem:[%s4424_s2 + $0xf8] sm:$0xff] }
 0x1f6   :  { %3444 = vmatprep.subr.bf16.mxu0 %v3904_v40  ;;  %3251 = vmatprep.mubr.msk.f32.mxu0 %vm1312_vm3, %v1280_v27  ;;  %v1028_v27 = vld [vmem:[%s4423_s1 + $0x128] sm:$0xff] }
 0x1f8   :  { %1130 = vmatmul.mubr.f32.gmra.mrb[34].mxu1 %v995_v9  ;;  %3252 = vmatmul.mubr.msk.f32.vlgmr.msra.gmra.mrb[66].mxu0 %vm1312_vm3, %v1281_v10  ;;  %v1030_v9 = vld [vmem:[%s4423_s1 + $0x138] sm:$0xff]  ;;  %v1029_v10 = vld [vmem:[%s4423_s1 + $0x130] sm:$0xff] }
 0x1f9   :  { %3446 = vmatpush3.bf16.msra.mxu0 %v3904_v40  ;;  %1134 = vmatprep.mubr.f32.mxu1 %v998_v11  ;;  %v1284_v40 = vld [vmem:[%s4424_s2 + $0x20] sm:$0xff]  ;;  %v1032_v11 = vld [vmem:[%s4423_s1 + $0x148] sm:$0xff] }
 0x1fa   :  { %3448 = vmatprep.subr.bf16.mxu0 %v3908_v46  ;;  %3258 = vmatprep.mubr.msk.f32.mxu0 %vm1312_vm3, %v1282_v34  ;;  %v1031_v34 = vld [vmem:[%s4423_s1 + $0x140] sm:$0xff] }
 0x1fc   :  { %1135 = vmatmul.mubr.f32.gmra.mrb[36].mxu1 %v997_v12  ;;  %3259 = vmatmul.mubr.msk.f32.vlgmr.msra.gmra.mrb[68].mxu0 %vm1312_vm3, %v1283_v14  ;;  %v1034_v12 = vld [vmem:[%s4423_s1 + $0x158] sm:$0xff]  ;;  %v1033_v14 = vld [vmem:[%s4423_s1 + $0x150] sm:$0xff] }
 0x1fd   :  { %3450 = vmatpush3.bf16.msra.mxu0 %v3908_v46  ;;  %1139 = vmatprep.mubr.f32.mxu1 %v1000_v15  ;;  %v1286_v46 = vld [vmem:[%s4424_s2 + $0x30] sm:$0xff]  ;;  %v1036_v15 = vld [vmem:[%s4423_s1 + $0x168] sm:$0xff] }
 0x1fe   :  { %3452 = vmatprep.subr.bf16.mxu0 %v3912_v52  ;;  %3265 = vmatprep.mubr.msk.f32.mxu0 %vm1312_vm3, %v1284_v40  ;;  %v1035_v40 = vld [vmem:[%s4423_s1 + $0x160] sm:$0xff] }
 0x200   :  { %1140 = vmatmul.mubr.f32.gmra.mrb[38].mxu1 %v999_v16  ;;  %3266 = vmatmul.mubr.msk.f32.vlgmr.msra.gmra.mrb[70].mxu0 %vm1312_vm3, %v1285_v17  ;;  %v1038_v16 = vld [vmem:[%s4423_s1 + $0x178] sm:$0xff]  ;;  %v1037_v17 = vld [vmem:[%s4423_s1 + $0x170] sm:$0xff] }
 0x201   :  { %3454 = vmatpush3.bf16.msra.mxu0 %v3912_v52  ;;  %1144 = vmatprep.mubr.f32.mxu1 %v1002_v18  ;;  %v1288_v52 = vld [vmem:[%s4424_s2 + $0x40] sm:$0xff]  ;;  %v1040_v18 = vld [vmem:[%s4423_s1 + $0x188] sm:$0xff] }
 0x202   :  { %3456 = vmatprep.subr.bf16.mxu0 %v3916_v59  ;;  %3272 = vmatprep.mubr.msk.f32.mxu0 %vm1312_vm3, %v1286_v46  ;;  %v1039_v46 = vld [vmem:[%s4423_s1 + $0x180] sm:$0xff] }
 0x204   :  { %1145 = vmatmul.mubr.f32.gmra.mrb[40].mxu1 %v1001_v20  ;;  %3273 = vmatmul.mubr.msk.f32.vlgmr.msra.gmra.mrb[72].mxu0 %vm1312_vm3, %v1287_v21  ;;  %v1042_v20 = vld [vmem:[%s4423_s1 + $0x198] sm:$0xff]  ;;  %v1041_v21 = vld [vmem:[%s4423_s1 + $0x190] sm:$0xff] }
 0x205   :  { %3458 = vmatpush3.bf16.msra.mxu0 %v3916_v59  ;;  %1149 = vmatprep.mubr.f32.mxu1 %v1004_v22  ;;  %v1290_v59 = vld [vmem:[%s4424_s2 + $0x50] sm:$0xff]  ;;  %v1044_v22 = vld [vmem:[%s4423_s1 + $0x1a8] sm:$0xff] }
 0x206   :  { %3460 = vmatprep.subr.bf16.mxu0 %v3920_v1  ;;  %3279 = vmatprep.mubr.msk.f32.mxu0 %vm1312_vm3, %v1288_v52  ;;  %v1043_v52 = vld [vmem:[%s4423_s1 + $0x1a0] sm:$0xff] }
 0x208   :  { %1150 = vmatmul.mubr.f32.gmra.mrb[42].mxu1 %v1003_v23  ;;  %3280 = vmatmul.mubr.msk.f32.vlgmr.msra.gmra.mrb[74].mxu0 %vm1312_vm3, %v1289_v24  ;;  %v1046_v23 = vld [vmem:[%s4423_s1 + $0x1b8] sm:$0xff]  ;;  %v1045_v24 = vld [vmem:[%s4423_s1 + $0x1b0] sm:$0xff] }
 0x209   :  { %3462 = vmatpush3.bf16.msra.mxu0 %v3920_v1  ;;  %1154 = vmatprep.mubr.f32.mxu1 %v1006_v26  ;;  %v1292_v1 = vld [vmem:[%s4424_s2 + $0x60] sm:$0xff]  ;;  %v1048_v26 = vld [vmem:[%s4423_s1 + $0x1c8] sm:$0xff] }
 0x20a   :  { %3464 = vmatprep.subr.bf16.mxu0 %v3924_v7  ;;  %3286 = vmatprep.mubr.msk.f32.mxu0 %vm1312_vm3, %v1290_v59  ;;  %v1047_v59 = vld [vmem:[%s4423_s1 + $0x1c0] sm:$0xff] }
 0x20c   :  { %1155 = vmatmul.mubr.f32.gmra.mrb[44].mxu1 %v1005_v57  ;;  %3287 = vmatmul.mubr.msk.f32.vlgmr.msra.gmra.mrb[76].mxu0 %vm1312_vm3, %v1291_v28  ;;  %v1050_v57 = vld [vmem:[%s4423_s1 + $0x1d8] sm:$0xff]  ;;  %v1049_v28 = vld [vmem:[%s4423_s1 + $0x1d0] sm:$0xff] }
 0x20d   :  { %3466 = vmatpush3.bf16.msra.mxu0 %v3924_v7  ;;  %1159 = vmatprep.mubr.f32.mxu1 %v1008_v29  ;;  %v1294_v7 = vld [vmem:[%s4424_s2 + $0x70] sm:$0xff]  ;;  %v1052_v29 = vld [vmem:[%s4423_s1 + $0x1e8] sm:$0xff] }
 0x20e   :  { %3468 = vmatprep.subr.bf16.mxu0 %v3928_v13  ;;  %3293 = vmatprep.mubr.msk.f32.mxu0 %vm1312_vm3, %v1292_v1  ;;  %v1051_v1 = vld [vmem:[%s4423_s1 + $0x1e0] sm:$0xff] }
 0x210   :  { %1160 = vmatmul.mubr.f32.gmra.mrb[46].mxu1 %v1007_v30  ;;  %3294 = vmatmul.mubr.msk.f32.vlgmr.msra.gmra.mrb[78].mxu0 %vm1312_vm3, %v1293_v32  ;;  %v1054_v30 = vld [vmem:[%s4423_s1 + $0x1f8] sm:$0xff]  ;;  %v1053_v32 = vld [vmem:[%s4423_s1 + $0x1f0] sm:$0xff] }
 0x211   :  { %3470 = vmatpush3.bf16.msra.mxu0 %v3928_v13  ;;  %1164 = vmatprep.mubr.f32.mxu1 %v1010_v33  ;;  %v1296_v13 = vld [vmem:[%s4424_s2 + $0x80] sm:$0xff] }
 0x212   :  { %3472 = vmatprep.subr.bf16.mxu0 %v3932_v19  ;;  %3300 = vmatprep.mubr.msk.f32.mxu0 %vm1312_vm3, %v1294_v7 }
 0x214   :  { %1165 = vmatmul.mubr.f32.gmra.mrb[48].mxu1 %v1009_v35  ;;  %3301 = vmatmul.mubr.msk.f32.vlgmr.msra.gmra.mrb[80].mxu0 %vm1312_vm3, %v1295_v36 }
 0x215   :  { %3474 = vmatpush3.bf16.msra.mxu0 %v3932_v19  ;;  %1169 = vmatprep.mubr.f32.mxu1 %v1012_v37  ;;  %v1298_v19 = vld [vmem:[%s4424_s2 + $0x90] sm:$0xff] }
 0x216   :  { %3476 = vmatprep.subr.bf16.mxu0 %v3936_v25  ;;  %3307 = vmatprep.mubr.msk.f32.mxu0 %vm1312_vm3, %v1296_v13 }
 0x218   :  { %1170 = vmatmul.mubr.f32.gmra.mrb[50].mxu1 %v1011_v39  ;;  %3308 = vmatmul.mubr.msk.f32.vlgmr.msra.gmra.mrb[82].mxu0 %vm1312_vm3, %v1297_v41  ;;  %v4311_v39 = vld [vmem:[%s4429_s7] ss:$0 sm:$0xff] }
 0x219   :  { %3478 = vmatpush3.bf16.msra.mxu0 %v3936_v25  ;;  %1174 = vmatprep.mubr.f32.mxu1 %v1014_v42  ;;  %v1300_v25 = vld [vmem:[%s4424_s2 + $0xa0] sm:$0xff] }
 0x21a   :  { %3480 = vmatprep.subr.bf16.mxu0 %v3940_v31  ;;  %3314 = vmatprep.mubr.msk.f32.mxu0 %vm1312_vm3, %v1298_v19 }
 0x21c   :  { %1175 = vmatmul.mubr.f32.gmra.mrb[52].mxu1 %v1013_v43  ;;  %3315 = vmatmul.mubr.msk.f32.vlgmr.msra.gmra.mrb[84].mxu0 %vm1312_vm3, %v1299_v44 }
 0x21d   :  { %3482 = vmatpush3.bf16.msra.mxu0 %v3940_v31  ;;  %1179 = vmatprep.mubr.f32.mxu1 %v1016_v47  ;;  %v1302_v31 = vld [vmem:[%s4424_s2 + $0xb0] sm:$0xff] }
 0x21e   :  { %3484 = vmatprep.subr.bf16.mxu0 %v3944_v38  ;;  %3321 = vmatprep.mubr.msk.f32.mxu0 %vm1312_vm3, %v1300_v25 }
 0x220   :  { %1180 = vmatmul.mubr.f32.gmra.mrb[54].mxu1 %v1015_v48  ;;  %3322 = vmatmul.mubr.msk.f32.vlgmr.msra.gmra.mrb[86].mxu0 %vm1312_vm3, %v1301_v49 }
 0x221   :  { %3486 = vmatpush3.bf16.msra.mxu0 %v3944_v38  ;;  %1184 = vmatprep.mubr.f32.mxu1 %v1018_v50  ;;  %v1304_v38 = vld [vmem:[%s4424_s2 + $0xc0] sm:$0xff] }
 0x222   :  { %3488 = vmatprep.subr.bf16.mxu0 %v3948_v45  ;;  %3328 = vmatprep.mubr.msk.f32.mxu0 %vm1312_vm3, %v1302_v31 }
 0x224   :  { %1185 = vmatmul.mubr.f32.gmra.mrb[56].mxu1 %v1017_v51  ;;  %3329 = vmatmul.mubr.msk.f32.vlgmr.msra.gmra.mrb[88].mxu0 %vm1312_vm3, %v1303_v54 }
 0x225   :  { %3490 = vmatpush3.bf16.msra.mxu0 %v3948_v45  ;;  %1189 = vmatprep.mubr.f32.mxu1 %v1020_v55  ;;  %v1306_v45 = vld [vmem:[%s4424_s2 + $0xd0] sm:$0xff] }
 0x226   :  { %3492 = vmatprep.subr.bf16.mxu0 %v3952_v53  ;;  %3335 = vmatprep.mubr.msk.f32.mxu0 %vm1312_vm3, %v1304_v38 }
 0x228   :  { %1190 = vmatmul.mubr.f32.gmra.mrb[58].mxu1 %v1019_v56  ;;  %3336 = vmatmul.mubr.msk.f32.vlgmr.msra.gmra.mrb[90].mxu0 %vm1312_vm3, %v1305_v58 }
 0x229   :  { %3494 = vmatpush3.bf16.msra.mxu0 %v3952_v53  ;;  %1194 = vmatprep.mubr.f32.mxu1 %v1022_v60  ;;  %v1308_v53 = vld [vmem:[%s4424_s2 + $0xe0] sm:$0xff] }
 0x22a   :  { %3496 = vmatprep.subr.bf16.mxu0 %v3956_v61  ;;  %3342 = vmatprep.mubr.msk.f32.mxu0 %vm1312_vm3, %v1306_v45 }
 0x22c   :  { %1195 = vmatmul.mubr.f32.gmra.mrb[60].mxu1 %v1021_v62  ;;  %3343 = vmatmul.mubr.msk.f32.vlgmr.msra.gmra.mrb[92].mxu0 %vm1312_vm3, %v1307_v63 }
 0x22d   :  { %3498 = vmatpush3.bf16.msra.mxu0 %v3956_v61  ;;  %1199 = vmatprep.mubr.f32.mxu1 %v1024_v0  ;;  %v1310_v61 = vld [vmem:[%s4424_s2 + $0xf0] sm:$0xff] }
 0x22e   :  { %3500 = vmatprep.subr.bf16.mxu0 %v3960_v4  ;;  %3349 = vmatprep.mubr.msk.f32.mxu0 %vm1312_vm3, %v1308_v53 }
 0x230   :  { %1200 = vmatmul.mubr.f32.gmra.mrb[62].mxu1 %v1023_v2  ;;  %3350 = vmatmul.mubr.msk.f32.vlgmr.msra.gmra.mrb[94].mxu0 %vm1312_vm3, %v1309_v3 }
 0x231   :  { %3502 = vmatpush3.bf16.msra.mxu0 %v3960_v4  ;;  %1204 = vmatprep.mubr.f32.mxu1 %v1026_v5  ;;  %v1027_v4 = vld [vmem:[%s4423_s1 + $0x120] sm:$0xff]  ;;  %s3564_s1 = smov [#allocation2]  }
 0x232   :  { %3356 = vmatprep.mubr.msk.f32.mxu0 %vm1312_vm3, %v1310_v61  ;;  %s2750_s7 = sshll.u32 %s3564_s1, 4  ;;  %s2751_s7 = int_to_ptr.vmem [resolvable:$true] %s2750_s7 }
 0x233   :  { %s3539_s12 = scalar_lea.vmem %s2751_s7, 4096  ;;  %p3544_p1 = scmp.lt.s32.totalorder %s2751_s7, %s2751_s7 }
 0x234   :  { %1205 = vmatmul.mubr.f32.gmra.mrb[64].mxu1 %v1025_v6  ;;  %3357 = vmatmul.mubr.msk.f32.vlgmr.msra.gmra.mrb[96].mxu0 %vm1312_vm3, %v1311_v8  ;;  %p3540_p0 = scmp.ne.s32.totalorder %s2751_s7, %s3539_s12  ;;  %p3545_p2 = scmp.lt.s32.totalorder %s3539_s12, %s3539_s12 }
 0x235   :  { %1209 = vmatprep.mubr.f32.mxu1 %v1028_v27 }
 0x236   :  { %p3546_p3 = por %p3545_p2, %p3544_p1 }
 0x238   :  { %1210 = vmatmul.mubr.f32.gmra.mrb[66].mxu1 %v1027_v4  ;;  %p3547_p4 = pnand %p3546_p3, %p3540_p0 }
 0x239   :  { %1214 = vmatprep.mubr.f32.mxu1 %v1030_v9 }
 0x23c   :  { %1215 = vmatmul.mubr.f32.gmra.mrb[68].mxu1 %v1029_v10 }
 0x23d   :  { %1219 = vmatprep.mubr.f32.mxu1 %v1032_v11 }
 0x240   :  { %1220 = vmatmul.mubr.f32.gmra.mrb[70].mxu1 %v1031_v34 }
 0x241   :  { %1224 = vmatprep.mubr.f32.mxu1 %v1034_v12 }
 0x244   :  { %1225 = vmatmul.mubr.f32.gmra.mrb[72].mxu1 %v1033_v14 }
 0x245   :  { %1229 = vmatprep.mubr.f32.mxu1 %v1036_v15 }
 0x248   :  { %1230 = vmatmul.mubr.f32.gmra.mrb[74].mxu1 %v1035_v40 }
 0x249   :  { %1234 = vmatprep.mubr.f32.mxu1 %v1038_v16 }
 0x24c   :  { %1235 = vmatmul.mubr.f32.gmra.mrb[76].mxu1 %v1037_v17 }
 0x24d   :  { %1239 = vmatprep.mubr.f32.mxu1 %v1040_v18 }
 0x250   :  { %1240 = vmatmul.mubr.f32.gmra.mrb[78].mxu1 %v1039_v46 }
 0x251   :  { %1244 = vmatprep.mubr.f32.mxu1 %v1042_v20 }
 0x254   :  { %1245 = vmatmul.mubr.f32.gmra.mrb[80].mxu1 %v1041_v21 }
 0x255   :  { %1249 = vmatprep.mubr.f32.mxu1 %v1044_v22 }
 0x258   :  { %1250 = vmatmul.mubr.f32.gmra.mrb[82].mxu1 %v1043_v52 }
 0x259   :  { %1254 = vmatprep.mubr.f32.mxu1 %v1046_v23 }
 0x25c   :  { %1255 = vmatmul.mubr.f32.gmra.mrb[84].mxu1 %v1045_v24 }
 0x25d   :  { %1259 = vmatprep.mubr.f32.mxu1 %v1048_v26 }
 0x260   :  { %1260 = vmatmul.mubr.f32.gmra.mrb[86].mxu1 %v1047_v59 }
 0x261   :  { %1264 = vmatprep.mubr.f32.mxu1 %v1050_v57 }
 0x264   :  { %1265 = vmatmul.mubr.f32.gmra.mrb[88].mxu1 %v1049_v28 }
 0x265   :  { %1269 = vmatprep.mubr.f32.mxu1 %v1052_v29 }
 0x268   :  { %1270 = vmatmul.mubr.f32.gmra.mrb[90].mxu1 %v1051_v1 }
 0x269   :  { %1274 = vmatprep.mubr.f32.mxu1 %v1054_v30 }
 0x26c   :  { %1275 = vmatmul.mubr.f32.gmra.mrb[92].mxu1 %v1053_v32 }
 0x2c7   :  { %v1126_v33 = vpop.f32.mrb[32].mxu1  ;;  %v1121_v7 = vpop.f32.mrb[64].mxu0 }
 0x2c8   :  { %v1128_v35 = vpop.f32.mrb[33].mxu1  ;;  %v1123_v36 = vpop.f32.mrb[65].mxu0 }
 0x2cb   :  { %v1131_v37 = vpop.f32.mrb[34].mxu1  ;;  %v3253_v13 = vpop.f32.mrb[66].mxu0 }
 0x2cc   :  { %v2610_v41 = vadd.f32 %v3253_v13, %v1126_v33  ;;  %v1133_v42 = vpop.f32.mrb[35].mxu1  ;;  %v1385_v19 = vpop.f32.mrb[67].mxu0 }
 0x2cd   :  { %v2609_v43 = vadd.f32 %v1385_v19, %v1121_v7 }
 0x2ce   :  { %v2649_v44 = vadd.f32 %v4311_v39, %v2610_v41 }
 0x2cf   :  { %v2648_v47 = vadd.f32 %v4311_v39, %v2609_v43  ;;  %v1136_v25 = vpop.f32.mrb[36].mxu1  ;;  %v3260_v48 = vpop.f32.mrb[68].mxu0 }
 0x2d0   :  { %v2681_v49 = vmax.f32 %v2649_v44, 0.0  ;;  %v2612_v50 = vadd.f32 %v3260_v48, %v1136_v25  ;;  %v1138_v31 = vpop.f32.mrb[37].mxu1  ;;  %v1466_v51 = vpop.f32.mrb[69].mxu0 }
 0x2d1   :  { %v2680_v54 = vmax.f32 %v2648_v47, 0.0  ;;  %v2611_v55 = vadd.f32 %v1466_v51, %v1131_v37 }
 0x2d2   :  { %2714 = vst.msk [vmem:[#allocation2 + $0x8] sm:$0xff] %vm2712_vm4, %v2681_v49  ;;  %v2651_v38 = vadd.f32 %v4311_v39, %v2612_v50 }
 0x2d3   :  { %2713 = vst.msk [vmem:[#allocation2] sm:$0xff] %vm2712_vm4, %v2680_v54  ;;  %v2650_v56 = vadd.f32 %v4311_v39, %v2611_v55  ;;  %v1141_v58 = vpop.f32.mrb[38].mxu1  ;;  %v3267_v60 = vpop.f32.mrb[70].mxu0 }
 0x2d4   :  { %v2683_v45 = vmax.f32 %v2651_v38, 0.0  ;;  %v1143_v62 = vpop.f32.mrb[39].mxu1  ;;  %v1547_v63 = vpop.f32.mrb[71].mxu0 }
 0x2d5   :  { %v2682_v0 = vmax.f32 %v2650_v56, 0.0  ;;  %v2613_v53 = vadd.f32 %v1547_v63, %v1141_v58 }
 0x2d6   :  { %2716 = vst.msk [vmem:[#allocation2 + $0x18] sm:$0xff] %vm2712_vm4, %v2683_v45 }
 0x2d7   :  { %2715 = vst.msk [vmem:[#allocation2 + $0x10] sm:$0xff] %vm2712_vm4, %v2682_v0  ;;  %v2652_v2 = vadd.f32 %v4311_v39, %v2613_v53  ;;  %v1146_v3 = vpop.f32.mrb[40].mxu1  ;;  %v3274_v5 = vpop.f32.mrb[72].mxu0 }
 0x2d8   :  { %v2614_v61 = vadd.f32 %v3267_v60, %v1146_v3  ;;  %v1148_v6 = vpop.f32.mrb[41].mxu1  ;;  %v1628_v8 = vpop.f32.mrb[73].mxu0 }
 0x2d9   :  { %v2684_v27 = vmax.f32 %v2652_v2, 0.0 }
 0x2da   :  { %v2653_v4 = vadd.f32 %v4311_v39, %v2614_v61 }
 0x2db   :  { %2717 = vst.msk [vmem:[#allocation2 + $0x20] sm:$0xff] %vm2712_vm4, %v2684_v27  ;;  %v1151_v9 = vpop.f32.mrb[42].mxu1  ;;  %v3281_v10 = vpop.f32.mrb[74].mxu0 }
 0x2dc   :  { %v2685_v11 = vmax.f32 %v2653_v4, 0.0  ;;  %v1153_v34 = vpop.f32.mrb[43].mxu1  ;;  %v2615_v12 = vadd.f32 %v1628_v8, %v1151_v9  ;;  %v1709_v14 = vpop.f32.mrb[75].mxu0 }
 0x2de   :  { %2718 = vst.msk [vmem:[#allocation2 + $0x28] sm:$0xff] %vm2712_vm4, %v2685_v11  ;;  %v2654_v15 = vadd.f32 %v4311_v39, %v2615_v12 }
 0x2df   :  { %v1156_v40 = vpop.f32.mrb[44].mxu1  ;;  %v3288_v16 = vpop.f32.mrb[76].mxu0 }
 0x2e0   :  { %v2686_v17 = vmax.f32 %v2654_v15, 0.0  ;;  %v2616_v18 = vadd.f32 %v3274_v5, %v1156_v40  ;;  %v1158_v46 = vpop.f32.mrb[45].mxu1  ;;  %v1790_v20 = vpop.f32.mrb[77].mxu0 }
 0x2e2   :  { %2719 = vst.msk [vmem:[#allocation2 + $0x30] sm:$0xff] %vm2712_vm4, %v2686_v17  ;;  %v2655_v21 = vadd.f32 %v4311_v39, %v2616_v18 }
 0x2e3   :  { %v1161_v22 = vpop.f32.mrb[46].mxu1  ;;  %v3295_v52 = vpop.f32.mrb[78].mxu0 }
 0x2e4   :  { %v2687_v23 = vmax.f32 %v2655_v21, 0.0  ;;  %v1163_v24 = vpop.f32.mrb[47].mxu1  ;;  %v2617_v26 = vadd.f32 %v1709_v14, %v1161_v22  ;;  %v1871_v59 = vpop.f32.mrb[79].mxu0 }
 0x2e6   :  { %2720 = vst.msk [vmem:[#allocation2 + $0x38] sm:$0xff] %vm2712_vm4, %v2687_v23  ;;  %v2656_v57 = vadd.f32 %v4311_v39, %v2617_v26 }
 0x2e7   :  { %v1166_v28 = vpop.f32.mrb[48].mxu1  ;;  %v3302_v29 = vpop.f32.mrb[80].mxu0 }
 0x2e8   :  { %v2688_v1 = vmax.f32 %v2656_v57, 0.0  ;;  %v2618_v30 = vadd.f32 %v3281_v10, %v1166_v28  ;;  %v1168_v32 = vpop.f32.mrb[49].mxu1  ;;  %v1952_v33 = vpop.f32.mrb[81].mxu0 }
 0x2ea   :  { %2721 = vst.msk [vmem:[#allocation2 + $0x40] sm:$0xff] %vm2712_vm4, %v2688_v1  ;;  %v2657_v7 = vadd.f32 %v4311_v39, %v2618_v30 }
 0x2eb   :  { %v1171_v35 = vpop.f32.mrb[50].mxu1  ;;  %v3309_v36 = vpop.f32.mrb[82].mxu0 }
 0x2ec   :  { %v2689_v37 = vmax.f32 %v2657_v7, 0.0  ;;  %v1173_v13 = vpop.f32.mrb[51].mxu1  ;;  %v2619_v41 = vadd.f32 %v1790_v20, %v1171_v35  ;;  %v2033_v42 = vpop.f32.mrb[83].mxu0 }
 0x2ee   :  { %2722 = vst.msk [vmem:[#allocation2 + $0x48] sm:$0xff] %vm2712_vm4, %v2689_v37  ;;  %v2658_v19 = vadd.f32 %v4311_v39, %v2619_v41 }
 0x2ef   :  { %v1176_v43 = vpop.f32.mrb[52].mxu1  ;;  %v4334_v44 = vpop.f32.mrb[84].mxu0 }
 0x2f0   :  { %v2690_v47 = vmax.f32 %v2658_v19, 0.0  ;;  %v2620_v25 = vadd.f32 %v3288_v16, %v1176_v43  ;;  %v1178_v48 = vpop.f32.mrb[53].mxu1  ;;  %v2114_v49 = vpop.f32.mrb[85].mxu0 }
 0x2f2   :  { %2723 = vst.msk [vmem:[#allocation2 + $0x50] sm:$0xff] %vm2712_vm4, %v2690_v47  ;;  %v2659_v50 = vadd.f32 %v4311_v39, %v2620_v25 }
 0x2f3   :  { %v1181_v31 = vpop.f32.mrb[54].mxu1  ;;  %v4338_v51 = vpop.f32.mrb[86].mxu0 }
 0x2f4   :  { %v2691_v54 = vmax.f32 %v2659_v50, 0.0  ;;  %v1183_v55 = vpop.f32.mrb[55].mxu1  ;;  %v2621_v38 = vadd.f32 %v1871_v59, %v1181_v31  ;;  %v2195_v56 = vpop.f32.mrb[87].mxu0 }
 0x2f6   :  { %2724 = vst.msk [vmem:[#allocation2 + $0x58] sm:$0xff] %vm2712_vm4, %v2691_v54  ;;  %v2660_v58 = vadd.f32 %v4311_v39, %v2621_v38 }
 0x2f7   :  { %v1186_v60 = vpop.f32.mrb[56].mxu1  ;;  %v4342_v45 = vpop.f32.mrb[88].mxu0 }
 0x2f8   :  { %v2692_v62 = vmax.f32 %v2660_v58, 0.0  ;;  %v2622_v63 = vadd.f32 %v3295_v52, %v1186_v60  ;;  %v1188_v0 = vpop.f32.mrb[57].mxu1  ;;  %v2276_v53 = vpop.f32.mrb[89].mxu0 }
 0x2fa   :  { %2725 = vst.msk [vmem:[#allocation2 + $0x60] sm:$0xff] %vm2712_vm4, %v2692_v62  ;;  %v2661_v2 = vadd.f32 %v4311_v39, %v2622_v63 }
 0x2fb   :  { %v1191_v3 = vpop.f32.mrb[58].mxu1  ;;  %v4346_v5 = vpop.f32.mrb[90].mxu0 }
 0x2fc   :  { %v2693_v61 = vmax.f32 %v2661_v2, 0.0  ;;  %v1193_v6 = vpop.f32.mrb[59].mxu1  ;;  %v2623_v8 = vadd.f32 %v1952_v33, %v1191_v3  ;;  %v4348_v27 = vpop.f32.mrb[91].mxu0 }
 0x2fe   :  { %2726 = vst.msk [vmem:[#allocation2 + $0x68] sm:$0xff] %vm2712_vm4, %v2693_v61  ;;  %v2662_v4 = vadd.f32 %v4311_v39, %v2623_v8 }
 0x2ff   :  { %v1196_v9 = vpop.f32.mrb[60].mxu1  ;;  %v4352_v10 = vpop.f32.mrb[92].mxu0 }
 0x300   :  { %v2694_v11 = vmax.f32 %v2662_v4, 0.0  ;;  %v2624_v34 = vadd.f32 %v3302_v29, %v1196_v9  ;;  %v1198_v12 = vpop.f32.mrb[61].mxu1  ;;  %v4354_v14 = vpop.f32.mrb[93].mxu0 }
 0x302   :  { %2727 = vst.msk [vmem:[#allocation2 + $0x70] sm:$0xff] %vm2712_vm4, %v2694_v11  ;;  %v2663_v15 = vadd.f32 %v4311_v39, %v2624_v34 }
 0x303   :  { %v1201_v40 = vpop.f32.mrb[62].mxu1  ;;  %v4358_v16 = vpop.f32.mrb[94].mxu0 }
 0x304   :  { %v2695_v17 = vmax.f32 %v2663_v15, 0.0  ;;  %v1203_v18 = vpop.f32.mrb[63].mxu1  ;;  %v2625_v46 = vadd.f32 %v2033_v42, %v1201_v40  ;;  %v4360_v20 = vpop.f32.mrb[95].mxu0 }
 0x306   :  { %2728 = vst.msk [vmem:[#allocation2 + $0x78] sm:$0xff] %vm2712_vm4, %v2695_v17  ;;  %v2664_v21 = vadd.f32 %v4311_v39, %v2625_v46 }
 0x307   :  { %v1206_v22 = vpop.f32.mrb[64].mxu1  ;;  %v4364_v52 = vpop.f32.mrb[96].mxu0 }
 0x308   :  { %v2696_v23 = vmax.f32 %v2664_v21, 0.0  ;;  %v2626_v24 = vadd.f32 %v3309_v36, %v1206_v22  ;;  %v1208_v26 = vpop.f32.mrb[65].mxu1  ;;  %v4366_v59 = vpop.f32.mrb[97].mxu0 }
 0x30a   :  { %2729 = vst.msk [vmem:[#allocation2 + $0x80] sm:$0xff] %vm2712_vm4, %v2696_v23  ;;  %v2665_v57 = vadd.f32 %v4311_v39, %v2626_v24 }
 0x30b   :  { %v1211_v28 = vpop.f32.mrb[66].mxu1 }
 0x30c   :  { %v2697_v29 = vmax.f32 %v2665_v57, 0.0  ;;  %v1213_v1 = vpop.f32.mrb[67].mxu1  ;;  %v2627_v30 = vadd.f32 %v2114_v49, %v1211_v28 }
 0x30e   :  { %2730 = vst.msk [vmem:[#allocation2 + $0x88] sm:$0xff] %vm2712_vm4, %v2697_v29  ;;  %v2666_v32 = vadd.f32 %v4311_v39, %v2627_v30 }
 0x30f   :  { %v1216_v33 = vpop.f32.mrb[68].mxu1 }
 0x310   :  { %v2698_v7 = vmax.f32 %v2666_v32, 0.0  ;;  %v2628_v35 = vadd.f32 %v4334_v44, %v1216_v33  ;;  %v1218_v36 = vpop.f32.mrb[69].mxu1 }
 0x312   :  { %2731 = vst.msk [vmem:[#allocation2 + $0x90] sm:$0xff] %vm2712_vm4, %v2698_v7  ;;  %v2667_v37 = vadd.f32 %v4311_v39, %v2628_v35 }
 0x313   :  { %v1221_v13 = vpop.f32.mrb[70].mxu1 }
 0x314   :  { %v2699_v41 = vmax.f32 %v2667_v37, 0.0  ;;  %v1223_v42 = vpop.f32.mrb[71].mxu1  ;;  %v2629_v19 = vadd.f32 %v2195_v56, %v1221_v13 }
 0x316   :  { %2732 = vst.msk [vmem:[#allocation2 + $0x98] sm:$0xff] %vm2712_vm4, %v2699_v41  ;;  %v2668_v43 = vadd.f32 %v4311_v39, %v2629_v19 }
 0x317   :  { %v1226_v47 = vpop.f32.mrb[72].mxu1 }
 0x318   :  { %v2700_v25 = vmax.f32 %v2668_v43, 0.0  ;;  %v2630_v48 = vadd.f32 %v4338_v51, %v1226_v47  ;;  %v1228_v49 = vpop.f32.mrb[73].mxu1 }
 0x31a   :  { %2733 = vst.msk [vmem:[#allocation2 + $0xa0] sm:$0xff] %vm2712_vm4, %v2700_v25  ;;  %v2669_v44 = vadd.f32 %v4311_v39, %v2630_v48 }
 0x31b   :  { %v1231_v50 = vpop.f32.mrb[74].mxu1 }
 0x31c   :  { %v2701_v31 = vmax.f32 %v2669_v44, 0.0  ;;  %v1233_v54 = vpop.f32.mrb[75].mxu1  ;;  %v2631_v55 = vadd.f32 %v2276_v53, %v1231_v50 }
 0x31e   :  { %2734 = vst.msk [vmem:[#allocation2 + $0xa8] sm:$0xff] %vm2712_vm4, %v2701_v31  ;;  %v2670_v38 = vadd.f32 %v4311_v39, %v2631_v55 }
 0x31f   :  { %v1236_v56 = vpop.f32.mrb[76].mxu1 }
 0x320   :  { %v2702_v58 = vmax.f32 %v2670_v38, 0.0  ;;  %v2632_v60 = vadd.f32 %v4342_v45, %v1236_v56  ;;  %v1238_v62 = vpop.f32.mrb[77].mxu1 }
 0x322   :  { %2735 = vst.msk [vmem:[#allocation2 + $0xb0] sm:$0xff] %vm2712_vm4, %v2702_v58  ;;  %v2671_v51 = vadd.f32 %v4311_v39, %v2632_v60 }
 0x323   :  { %v1241_v63 = vpop.f32.mrb[78].mxu1 }
 0x324   :  { %v2703_v0 = vmax.f32 %v2671_v51, 0.0  ;;  %v1243_v2 = vpop.f32.mrb[79].mxu1  ;;  %v2633_v3 = vadd.f32 %v4348_v27, %v1241_v63 }
 0x326   :  { %2736 = vst.msk [vmem:[#allocation2 + $0xb8] sm:$0xff] %vm2712_vm4, %v2703_v0  ;;  %v2672_v53 = vadd.f32 %v4311_v39, %v2633_v3 }
 0x327   :  { %v1246_v61 = vpop.f32.mrb[80].mxu1 }
 0x328   :  { %v2704_v6 = vmax.f32 %v2672_v53, 0.0  ;;  %v2634_v8 = vadd.f32 %v4346_v5, %v1246_v61  ;;  %v1248_v4 = vpop.f32.mrb[81].mxu1 }
 0x32a   :  { %2737 = vst.msk [vmem:[#allocation2 + $0xc0] sm:$0xff] %vm2712_vm4, %v2704_v6  ;;  %v2673_v45 = vadd.f32 %v4311_v39, %v2634_v8 }
 0x32b   :  { %v1251_v9 = vpop.f32.mrb[82].mxu1 }
 0x32c   :  { %v2705_v11 = vmax.f32 %v2673_v45, 0.0  ;;  %v1253_v34 = vpop.f32.mrb[83].mxu1  ;;  %v2635_v12 = vadd.f32 %v4354_v14, %v1251_v9 }
 0x32e   :  { %2738 = vst.msk [vmem:[#allocation2 + $0xc8] sm:$0xff] %vm2712_vm4, %v2705_v11  ;;  %v2674_v27 = vadd.f32 %v4311_v39, %v2635_v12 }
 0x32f   :  { %v1256_v15 = vpop.f32.mrb[84].mxu1 }
 0x330   :  { %v2706_v40 = vmax.f32 %v2674_v27, 0.0  ;;  %v2636_v17 = vadd.f32 %v4352_v10, %v1256_v15  ;;  %v1258_v18 = vpop.f32.mrb[85].mxu1 }
 0x332   :  { %2739 = vst.msk [vmem:[#allocation2 + $0xd0] sm:$0xff] %vm2712_vm4, %v2706_v40  ;;  %v2675_v5 = vadd.f32 %v4311_v39, %v2636_v17 }
 0x333   :  { %v1261_v46 = vpop.f32.mrb[86].mxu1 }
 0x334   :  { %v2707_v21 = vmax.f32 %v2675_v5, 0.0  ;;  %v1263_v22 = vpop.f32.mrb[87].mxu1  ;;  %v2637_v23 = vadd.f32 %v4360_v20, %v1261_v46 }
 0x336   :  { %2740 = vst.msk [vmem:[#allocation2 + $0xd8] sm:$0xff] %vm2712_vm4, %v2707_v21  ;;  %v2676_v14 = vadd.f32 %v4311_v39, %v2637_v23 }
 0x337   :  { %v1266_v24 = vpop.f32.mrb[88].mxu1 }
 0x338   :  { %v2708_v26 = vmax.f32 %v2676_v14, 0.0  ;;  %v2638_v57 = vadd.f32 %v4358_v16, %v1266_v24  ;;  %v1268_v28 = vpop.f32.mrb[89].mxu1 }
 0x33a   :  { %2741 = vst.msk [vmem:[#allocation2 + $0xe0] sm:$0xff] %vm2712_vm4, %v2708_v26  ;;  %v2677_v10 = vadd.f32 %v4311_v39, %v2638_v57 }
 0x33b   :  { %v1271_v29 = vpop.f32.mrb[90].mxu1 }
 0x33c   :  { %v2709_v1 = vmax.f32 %v2677_v10, 0.0  ;;  %v1273_v30 = vpop.f32.mrb[91].mxu1  ;;  %v2639_v32 = vadd.f32 %v4366_v59, %v1271_v29 }
 0x33e   :  { %2742 = vst.msk [vmem:[#allocation2 + $0xe8] sm:$0xff] %vm2712_vm4, %v2709_v1  ;;  %v2678_v20 = vadd.f32 %v4311_v39, %v2639_v32 }
 0x33f   :  { %v1276_v33 = vpop.f32.mrb[92].mxu1 }
 0x340   :  { %v2710_v7 = vmax.f32 %v2678_v20, 0.0  ;;  %v2640_v35 = vadd.f32 %v4364_v52, %v1276_v33  ;;  %v1278_v36 = vpop.f32.mrb[93].mxu1 }
 0x342   :  { %2743 = vst.msk [vmem:[#allocation2 + $0xf0] sm:$0xff] %vm2712_vm4, %v2710_v7  ;;  %v2679_v16 = vadd.f32 %v4311_v39, %v2640_v35 }
 0x344   :  { %v2711_v37 = vmax.f32 %v2679_v16, 0.0 }
 0x346   :  { %2744 = vst.msk [vmem:[#allocation2 + $0xf8] sm:$0xff] %vm2712_vm4, %v2711_v37 }
 0x347   :  { %3550 = shalt.err (!%p3547_p4)
}
 0x348   :  { %s3551_s14 = scalar_lea.hbm %s4430_s8, 4096 }
 0x349   :  { %p3552_p5 = scmp.ne.s32.totalorder %s4430_s8, %s3551_s14  ;;  %p3555_p6 = scmp.lt.u32.totalorder %s3551_s14, %s4430_s8 }
 0x34b   :  { %p3557_p7 = pnand %p3555_p6, %p3552_p5 }
 0x34d   :  { %3560 = shalt.err (!%p3557_p7)
}
 0x34e   :  { %s3565_s18 = smov 128   ;;  %s3566_s19 = smov 8  }
 0x34f   :  { %2756 = dma.vmem_to_hbm [thread:$0]  %s2751_s7, 4096, %s4430_s8, [#allocation3], %s3565_s18, %s3565_s18, %s3566_s19  }
 0x350   :  { %3561 = dma.done.wait [#allocation3], 4096  }
 0x351   :  { %3562 = vsyncadd [#allocation3], 4294963200 }
 0x352   :  { %2760 = vsyncpa [#allocation3], 1 }

</bundles_post_ra>
